<compile_context>
chip_gen: v5e
topology: v5e:2x2
jax: 0.10.0
libtpu: 0.0.40
codegen_flags: <defaults>
</compile_context>

<pallas_src>
import jax
import jax.numpy as jnp
from jax.experimental import pallas as pl
from jax.experimental.pallas import tpu as pltpu

IN, H1, H2, OUT = 8, 6, 4, 1


def mlp_kernel(w1_ref, b1_ref, w2_ref, b2_ref, w3_ref, b3_ref, x_ref, o_ref):
    """x_ref: (8, TB) VMEM tile (features x batch). o_ref: (1, TB) lane-dense.

    Weights are PyTorch-layout (out, in) f32 in SMEM; biases are (out,) in SMEM.
    Each output neuron = sum of scalar-broadcast FMAs over (1, TB) lane strips.
    """
    # Load the 8 feature rows once; each is a (1, TB) strip (batch on lanes).
    x_rows = [x_ref[k:k + 1, :] for k in range(IN)]

    # linear1 (8 -> 6) + sigmoid, fully unrolled on the VPU.
    h1 = []
    for j in range(H1):
        acc = x_rows[0] * w1_ref[j, 0]
        for k in range(1, IN):
            acc = acc + x_rows[k] * w1_ref[j, k]
        h1.append(jax.nn.sigmoid(acc + b1_ref[j]))

    # linear2 (6 -> 4) + sigmoid.
    h2 = []
    for j in range(H2):
        acc = h1[0] * w2_ref[j, 0]
        for k in range(1, H1):
            acc = acc + h1[k] * w2_ref[j, k]
        h2.append(jax.nn.sigmoid(acc + b2_ref[j]))

    # linear3 (4 -> 1) + sigmoid; single full-lane (1, TB) store.
    acc = h2[0] * w3_ref[0, 0]
    for k in range(1, H2):
        acc = acc + h2[k] * w3_ref[0, k]
    o_ref[...] = jax.nn.sigmoid(acc + b3_ref[0])


def mlp_forward(x, params, *, tb=512):
    """x: (B, 8) f32.  params: PyTorch-layout (out, in) weights + (out,) biases."""
    w1, b1, w2, b2, w3, b3 = params
    B = x.shape[0]
    n_tiles = max(1, pl.cdiv(B, tb))
    b_pad = n_tiles * tb

    # Layout plumbing (wrapper side): transpose to (features, batch) and pad the
    # batch axis so every tile is a full 128-multiple of lanes.
    x_t = jnp.pad(x, ((0, b_pad - B), (0, 0))).T  # (8, b_pad)

    smem = pl.BlockSpec(memory_space=pltpu.MemorySpace.SMEM)  # resident, untiled
    out = pl.pallas_call(
        mlp_kernel,
        out_shape=jax.ShapeDtypeStruct((1, b_pad), jnp.float32),
        grid=(n_tiles,),
        in_specs=[
            smem, smem, smem, smem, smem, smem,        # w1,b1,w2,b2,w3,b3
            pl.BlockSpec((IN, tb), lambda i: (0, i)),  # x tile: batch on lanes
        ],
        out_specs=pl.BlockSpec((OUT, tb), lambda i: (0, i)),
        compiler_params=pltpu.CompilerParams(
            dimension_semantics=("parallel",)),
    )(w1, b1, w2, b2, w3, b3, x_t)

    # Back to nn.Linear output layout (B, 1), dropping batch padding.
    return out[:, :B].T


def init_params(key):
    """Deterministic init mirroring nn.Linear (weights stored (out, in))."""
    ks = jax.random.split(key, 6)

    def linear(kw, kb, fan_out, fan_in):
        bound = 1.0 / jnp.sqrt(float(fan_in))
        w = jax.random.uniform(kw, (fan_out, fan_in), jnp.float32, -bound, bound)
        b = jax.random.uniform(kb, (fan_out,), jnp.float32, -bound, bound)
        return w, b

    w1, b1 = linear(ks[0], ks[1], H1, IN)
    w2, b2 = linear(ks[2], ks[3], H2, H1)
    w3, b3 = linear(ks[4], ks[5], OUT, H2)
    return w1, b1, w2, b2, w3, b3


def reference_forward(x, params):
    w1, b1, w2, b2, w3, b3 = params
    h = jax.nn.sigmoid(x @ w1.T + b1)
    h = jax.nn.sigmoid(h @ w2.T + b2)
    return jax.nn.sigmoid(h @ w3.T + b3)


if __name__ == "__main__":
    key = jax.random.PRNGKey(0)
    kx, kp = jax.random.split(key)
    B = 1024  # two 512-row batch tiles -> exercises the pipelined grid
    x = jax.random.normal(kx, (B, IN), jnp.float32)
    params = init_params(kp)

    out = mlp_forward(x, params)
    jax.block_until_ready(out)

    ref = reference_forward(x, params)
    assert out.shape == (B, 1)
    assert jnp.allclose(out, ref, atol=1e-5, rtol=1e-5), float(
        jnp.max(jnp.abs(out - ref)))
    print("KERNEL_OK")
</pallas_src>

<mosaic_0001>
module attributes {stable_mosaic.version = 11 : i64} {
  func.func @mlp_kernel(%arg0: i32, %arg1: memref<6x8xf32, #tpu.memory_space<smem>>, %arg2: memref<6xf32, #tpu.memory_space<smem>>, %arg3: memref<4x6xf32, #tpu.memory_space<smem>>, %arg4: memref<4xf32, #tpu.memory_space<smem>>, %arg5: memref<1x4xf32, #tpu.memory_space<smem>>, %arg6: memref<1xf32, #tpu.memory_space<smem>>, %arg7: memref<8x512xf32, #tpu.memory_space<vmem>>, %arg8: memref<1x512xf32, #tpu.memory_space<vmem>>) attributes {dimension_semantics = [#tpu.dimension_semantics<parallel>], iteration_bounds = array<i64: 2>, scalar_prefetch = 0 : i64, scratch_operands = 0 : i64, tpu.core_type = #tpu.core_type<tc>, window_params = [{transform_indices = @transform_0, window_bounds = array<i64: 6, 8>}, {transform_indices = @transform_1, window_bounds = array<i64: 6>}, {transform_indices = @transform_2, window_bounds = array<i64: 4, 6>}, {transform_indices = @transform_3, window_bounds = array<i64: 4>}, {transform_indices = @transform_4, window_bounds = array<i64: 1, 4>}, {transform_indices = @transform_5, window_bounds = array<i64: 1>}, {transform_indices = @transform_6, window_bounds = array<i64: 8, 512>}, {transform_indices = @transform_7, window_bounds = array<i64: 1, 512>}]} {
    %c0 = arith.constant 0 : index
    %c0_0 = arith.constant 0 : index
    %0 = vector.load %arg7[%c0, %c0_0] : memref<8x512xf32, #tpu.memory_space<vmem>>, vector<1x512xf32>
    %c1 = arith.constant 1 : index
    %c0_1 = arith.constant 0 : index
    %1 = vector.load %arg7[%c1, %c0_1] : memref<8x512xf32, #tpu.memory_space<vmem>>, vector<1x512xf32>
    %c2 = arith.constant 2 : index
    %c0_2 = arith.constant 0 : index
    %2 = vector.load %arg7[%c2, %c0_2] : memref<8x512xf32, #tpu.memory_space<vmem>>, vector<1x512xf32>
    %c3 = arith.constant 3 : index
    %c0_3 = arith.constant 0 : index
    %3 = vector.load %arg7[%c3, %c0_3] : memref<8x512xf32, #tpu.memory_space<vmem>>, vector<1x512xf32>
    %c4 = arith.constant 4 : index
    %c0_4 = arith.constant 0 : index
    %4 = vector.load %arg7[%c4, %c0_4] : memref<8x512xf32, #tpu.memory_space<vmem>>, vector<1x512xf32>
    %c5 = arith.constant 5 : index
    %c0_5 = arith.constant 0 : index
    %5 = vector.load %arg7[%c5, %c0_5] : memref<8x512xf32, #tpu.memory_space<vmem>>, vector<1x512xf32>
    %c6 = arith.constant 6 : index
    %c0_6 = arith.constant 0 : index
    %6 = vector.load %arg7[%c6, %c0_6] : memref<8x512xf32, #tpu.memory_space<vmem>>, vector<1x512xf32>
    %c7 = arith.constant 7 : index
    %c0_7 = arith.constant 0 : index
    %7 = vector.load %arg7[%c7, %c0_7] : memref<8x512xf32, #tpu.memory_space<vmem>>, vector<1x512xf32>
    %c0_8 = arith.constant 0 : index
    %c0_9 = arith.constant 0 : index
    %8 = memref.load %arg1[%c0_8, %c0_9] : memref<6x8xf32, #tpu.memory_space<smem>>
    %9 = vector.broadcast %8 : f32 to vector<1x512xf32>
    %10 = arith.mulf %0, %9 : vector<1x512xf32>
    %c0_10 = arith.constant 0 : index
    %c1_11 = arith.constant 1 : index
    %11 = memref.load %arg1[%c0_10, %c1_11] : memref<6x8xf32, #tpu.memory_space<smem>>
    %12 = vector.broadcast %11 : f32 to vector<1x512xf32>
    %13 = arith.mulf %1, %12 : vector<1x512xf32>
    %14 = arith.addf %10, %13 : vector<1x512xf32>
    %c0_12 = arith.constant 0 : index
    %c2_13 = arith.constant 2 : index
    %15 = memref.load %arg1[%c0_12, %c2_13] : memref<6x8xf32, #tpu.memory_space<smem>>
    %16 = vector.broadcast %15 : f32 to vector<1x512xf32>
    %17 = arith.mulf %2, %16 : vector<1x512xf32>
    %18 = arith.addf %14, %17 : vector<1x512xf32>
    %c0_14 = arith.constant 0 : index
    %c3_15 = arith.constant 3 : index
    %19 = memref.load %arg1[%c0_14, %c3_15] : memref<6x8xf32, #tpu.memory_space<smem>>
    %20 = vector.broadcast %19 : f32 to vector<1x512xf32>
    %21 = arith.mulf %3, %20 : vector<1x512xf32>
    %22 = arith.addf %18, %21 : vector<1x512xf32>
    %c0_16 = arith.constant 0 : index
    %c4_17 = arith.constant 4 : index
    %23 = memref.load %arg1[%c0_16, %c4_17] : memref<6x8xf32, #tpu.memory_space<smem>>
    %24 = vector.broadcast %23 : f32 to vector<1x512xf32>
    %25 = arith.mulf %4, %24 : vector<1x512xf32>
    %26 = arith.addf %22, %25 : vector<1x512xf32>
    %c0_18 = arith.constant 0 : index
    %c5_19 = arith.constant 5 : index
    %27 = memref.load %arg1[%c0_18, %c5_19] : memref<6x8xf32, #tpu.memory_space<smem>>
    %28 = vector.broadcast %27 : f32 to vector<1x512xf32>
    %29 = arith.mulf %5, %28 : vector<1x512xf32>
    %30 = arith.addf %26, %29 : vector<1x512xf32>
    %c0_20 = arith.constant 0 : index
    %c6_21 = arith.constant 6 : index
    %31 = memref.load %arg1[%c0_20, %c6_21] : memref<6x8xf32, #tpu.memory_space<smem>>
    %32 = vector.broadcast %31 : f32 to vector<1x512xf32>
    %33 = arith.mulf %6, %32 : vector<1x512xf32>
    %34 = arith.addf %30, %33 : vector<1x512xf32>
    %c0_22 = arith.constant 0 : index
    %c7_23 = arith.constant 7 : index
    %35 = memref.load %arg1[%c0_22, %c7_23] : memref<6x8xf32, #tpu.memory_space<smem>>
    %36 = vector.broadcast %35 : f32 to vector<1x512xf32>
    %37 = arith.mulf %7, %36 : vector<1x512xf32>
    %38 = arith.addf %34, %37 : vector<1x512xf32>
    %c0_24 = arith.constant 0 : index
    %39 = memref.load %arg2[%c0_24] : memref<6xf32, #tpu.memory_space<smem>>
    %40 = vector.broadcast %39 : f32 to vector<1x512xf32>
    %41 = arith.addf %38, %40 : vector<1x512xf32>
    %42 = arith.negf %41 : vector<1x512xf32>
    %43 = math.exp %42 : vector<1x512xf32>
    %cst = arith.constant 1.000000e+00 : f32
    %44 = vector.broadcast %cst : f32 to vector<1x512xf32>
    %45 = arith.addf %44, %43 : vector<1x512xf32>
    %46 = arith.divf %44, %45 : vector<1x512xf32>
    %c1_25 = arith.constant 1 : index
    %c0_26 = arith.constant 0 : index
    %47 = memref.load %arg1[%c1_25, %c0_26] : memref<6x8xf32, #tpu.memory_space<smem>>
    %48 = vector.broadcast %47 : f32 to vector<1x512xf32>
    %49 = arith.mulf %0, %48 : vector<1x512xf32>
    %c1_27 = arith.constant 1 : index
    %c1_28 = arith.constant 1 : index
    %50 = memref.load %arg1[%c1_27, %c1_28] : memref<6x8xf32, #tpu.memory_space<smem>>
    %51 = vector.broadcast %50 : f32 to vector<1x512xf32>
    %52 = arith.mulf %1, %51 : vector<1x512xf32>
    %53 = arith.addf %49, %52 : vector<1x512xf32>
    %c1_29 = arith.constant 1 : index
    %c2_30 = arith.constant 2 : index
    %54 = memref.load %arg1[%c1_29, %c2_30] : memref<6x8xf32, #tpu.memory_space<smem>>
    %55 = vector.broadcast %54 : f32 to vector<1x512xf32>
    %56 = arith.mulf %2, %55 : vector<1x512xf32>
    %57 = arith.addf %53, %56 : vector<1x512xf32>
    %c1_31 = arith.constant 1 : index
    %c3_32 = arith.constant 3 : index
    %58 = memref.load %arg1[%c1_31, %c3_32] : memref<6x8xf32, #tpu.memory_space<smem>>
    %59 = vector.broadcast %58 : f32 to vector<1x512xf32>
    %60 = arith.mulf %3, %59 : vector<1x512xf32>
    %61 = arith.addf %57, %60 : vector<1x512xf32>
    %c1_33 = arith.constant 1 : index
    %c4_34 = arith.constant 4 : index
    %62 = memref.load %arg1[%c1_33, %c4_34] : memref<6x8xf32, #tpu.memory_space<smem>>
    %63 = vector.broadcast %62 : f32 to vector<1x512xf32>
    %64 = arith.mulf %4, %63 : vector<1x512xf32>
    %65 = arith.addf %61, %64 : vector<1x512xf32>
    %c1_35 = arith.constant 1 : index
    %c5_36 = arith.constant 5 : index
    %66 = memref.load %arg1[%c1_35, %c5_36] : memref<6x8xf32, #tpu.memory_space<smem>>
    %67 = vector.broadcast %66 : f32 to vector<1x512xf32>
    %68 = arith.mulf %5, %67 : vector<1x512xf32>
    %69 = arith.addf %65, %68 : vector<1x512xf32>
    %c1_37 = arith.constant 1 : index
    %c6_38 = arith.constant 6 : index
    %70 = memref.load %arg1[%c1_37, %c6_38] : memref<6x8xf32, #tpu.memory_space<smem>>
    %71 = vector.broadcast %70 : f32 to vector<1x512xf32>
    %72 = arith.mulf %6, %71 : vector<1x512xf32>
    %73 = arith.addf %69, %72 : vector<1x512xf32>
    %c1_39 = arith.constant 1 : index
    %c7_40 = arith.constant 7 : index
    %74 = memref.load %arg1[%c1_39, %c7_40] : memref<6x8xf32, #tpu.memory_space<smem>>
    %75 = vector.broadcast %74 : f32 to vector<1x512xf32>
    %76 = arith.mulf %7, %75 : vector<1x512xf32>
    %77 = arith.addf %73, %76 : vector<1x512xf32>
    %c1_41 = arith.constant 1 : index
    %78 = memref.load %arg2[%c1_41] : memref<6xf32, #tpu.memory_space<smem>>
    %79 = vector.broadcast %78 : f32 to vector<1x512xf32>
    %80 = arith.addf %77, %79 : vector<1x512xf32>
    %81 = arith.negf %80 : vector<1x512xf32>
    %82 = math.exp %81 : vector<1x512xf32>
    %cst_42 = arith.constant 1.000000e+00 : f32
    %83 = vector.broadcast %cst_42 : f32 to vector<1x512xf32>
    %84 = arith.addf %83, %82 : vector<1x512xf32>
    %85 = arith.divf %83, %84 : vector<1x512xf32>
    %c2_43 = arith.constant 2 : index
    %c0_44 = arith.constant 0 : index
    %86 = memref.load %arg1[%c2_43, %c0_44] : memref<6x8xf32, #tpu.memory_space<smem>>
    %87 = vector.broadcast %86 : f32 to vector<1x512xf32>
    %88 = arith.mulf %0, %87 : vector<1x512xf32>
    %c2_45 = arith.constant 2 : index
    %c1_46 = arith.constant 1 : index
    %89 = memref.load %arg1[%c2_45, %c1_46] : memref<6x8xf32, #tpu.memory_space<smem>>
    %90 = vector.broadcast %89 : f32 to vector<1x512xf32>
    %91 = arith.mulf %1, %90 : vector<1x512xf32>
    %92 = arith.addf %88, %91 : vector<1x512xf32>
    %c2_47 = arith.constant 2 : index
    %c2_48 = arith.constant 2 : index
    %93 = memref.load %arg1[%c2_47, %c2_48] : memref<6x8xf32, #tpu.memory_space<smem>>
    %94 = vector.broadcast %93 : f32 to vector<1x512xf32>
    %95 = arith.mulf %2, %94 : vector<1x512xf32>
    %96 = arith.addf %92, %95 : vector<1x512xf32>
    %c2_49 = arith.constant 2 : index
    %c3_50 = arith.constant 3 : index
    %97 = memref.load %arg1[%c2_49, %c3_50] : memref<6x8xf32, #tpu.memory_space<smem>>
    %98 = vector.broadcast %97 : f32 to vector<1x512xf32>
    %99 = arith.mulf %3, %98 : vector<1x512xf32>
    %100 = arith.addf %96, %99 : vector<1x512xf32>
    %c2_51 = arith.constant 2 : index
    %c4_52 = arith.constant 4 : index
    %101 = memref.load %arg1[%c2_51, %c4_52] : memref<6x8xf32, #tpu.memory_space<smem>>
    %102 = vector.broadcast %101 : f32 to vector<1x512xf32>
    %103 = arith.mulf %4, %102 : vector<1x512xf32>
    %104 = arith.addf %100, %103 : vector<1x512xf32>
    %c2_53 = arith.constant 2 : index
    %c5_54 = arith.constant 5 : index
    %105 = memref.load %arg1[%c2_53, %c5_54] : memref<6x8xf32, #tpu.memory_space<smem>>
    %106 = vector.broadcast %105 : f32 to vector<1x512xf32>
    %107 = arith.mulf %5, %106 : vector<1x512xf32>
    %108 = arith.addf %104, %107 : vector<1x512xf32>
    %c2_55 = arith.constant 2 : index
    %c6_56 = arith.constant 6 : index
    %109 = memref.load %arg1[%c2_55, %c6_56] : memref<6x8xf32, #tpu.memory_space<smem>>
    %110 = vector.broadcast %109 : f32 to vector<1x512xf32>
    %111 = arith.mulf %6, %110 : vector<1x512xf32>
    %112 = arith.addf %108, %111 : vector<1x512xf32>
    %c2_57 = arith.constant 2 : index
    %c7_58 = arith.constant 7 : index
    %113 = memref.load %arg1[%c2_57, %c7_58] : memref<6x8xf32, #tpu.memory_space<smem>>
    %114 = vector.broadcast %113 : f32 to vector<1x512xf32>
    %115 = arith.mulf %7, %114 : vector<1x512xf32>
    %116 = arith.addf %112, %115 : vector<1x512xf32>
    %c2_59 = arith.constant 2 : index
    %117 = memref.load %arg2[%c2_59] : memref<6xf32, #tpu.memory_space<smem>>
    %118 = vector.broadcast %117 : f32 to vector<1x512xf32>
    %119 = arith.addf %116, %118 : vector<1x512xf32>
    %120 = arith.negf %119 : vector<1x512xf32>
    %121 = math.exp %120 : vector<1x512xf32>
    %cst_60 = arith.constant 1.000000e+00 : f32
    %122 = vector.broadcast %cst_60 : f32 to vector<1x512xf32>
    %123 = arith.addf %122, %121 : vector<1x512xf32>
    %124 = arith.divf %122, %123 : vector<1x512xf32>
    %c3_61 = arith.constant 3 : index
    %c0_62 = arith.constant 0 : index
    %125 = memref.load %arg1[%c3_61, %c0_62] : memref<6x8xf32, #tpu.memory_space<smem>>
    %126 = vector.broadcast %125 : f32 to vector<1x512xf32>
    %127 = arith.mulf %0, %126 : vector<1x512xf32>
    %c3_63 = arith.constant 3 : index
    %c1_64 = arith.constant 1 : index
    %128 = memref.load %arg1[%c3_63, %c1_64] : memref<6x8xf32, #tpu.memory_space<smem>>
    %129 = vector.broadcast %128 : f32 to vector<1x512xf32>
    %130 = arith.mulf %1, %129 : vector<1x512xf32>
    %131 = arith.addf %127, %130 : vector<1x512xf32>
    %c3_65 = arith.constant 3 : index
    %c2_66 = arith.constant 2 : index
    %132 = memref.load %arg1[%c3_65, %c2_66] : memref<6x8xf32, #tpu.memory_space<smem>>
    %133 = vector.broadcast %132 : f32 to vector<1x512xf32>
    %134 = arith.mulf %2, %133 : vector<1x512xf32>
    %135 = arith.addf %131, %134 : vector<1x512xf32>
    %c3_67 = arith.constant 3 : index
    %c3_68 = arith.constant 3 : index
    %136 = memref.load %arg1[%c3_67, %c3_68] : memref<6x8xf32, #tpu.memory_space<smem>>
    %137 = vector.broadcast %136 : f32 to vector<1x512xf32>
    %138 = arith.mulf %3, %137 : vector<1x512xf32>
    %139 = arith.addf %135, %138 : vector<1x512xf32>
    %c3_69 = arith.constant 3 : index
    %c4_70 = arith.constant 4 : index
    %140 = memref.load %arg1[%c3_69, %c4_70] : memref<6x8xf32, #tpu.memory_space<smem>>
    %141 = vector.broadcast %140 : f32 to vector<1x512xf32>
    %142 = arith.mulf %4, %141 : vector<1x512xf32>
    %143 = arith.addf %139, %142 : vector<1x512xf32>
    %c3_71 = arith.constant 3 : index
    %c5_72 = arith.constant 5 : index
    %144 = memref.load %arg1[%c3_71, %c5_72] : memref<6x8xf32, #tpu.memory_space<smem>>
    %145 = vector.broadcast %144 : f32 to vector<1x512xf32>
    %146 = arith.mulf %5, %145 : vector<1x512xf32>
    %147 = arith.addf %143, %146 : vector<1x512xf32>
    %c3_73 = arith.constant 3 : index
    %c6_74 = arith.constant 6 : index
    %148 = memref.load %arg1[%c3_73, %c6_74] : memref<6x8xf32, #tpu.memory_space<smem>>
    %149 = vector.broadcast %148 : f32 to vector<1x512xf32>
    %150 = arith.mulf %6, %149 : vector<1x512xf32>
    %151 = arith.addf %147, %150 : vector<1x512xf32>
    %c3_75 = arith.constant 3 : index
    %c7_76 = arith.constant 7 : index
    %152 = memref.load %arg1[%c3_75, %c7_76] : memref<6x8xf32, #tpu.memory_space<smem>>
    %153 = vector.broadcast %152 : f32 to vector<1x512xf32>
    %154 = arith.mulf %7, %153 : vector<1x512xf32>
    %155 = arith.addf %151, %154 : vector<1x512xf32>
    %c3_77 = arith.constant 3 : index
    %156 = memref.load %arg2[%c3_77] : memref<6xf32, #tpu.memory_space<smem>>
    %157 = vector.broadcast %156 : f32 to vector<1x512xf32>
    %158 = arith.addf %155, %157 : vector<1x512xf32>
    %159 = arith.negf %158 : vector<1x512xf32>
    %160 = math.exp %159 : vector<1x512xf32>
    %cst_78 = arith.constant 1.000000e+00 : f32
    %161 = vector.broadcast %cst_78 : f32 to vector<1x512xf32>
    %162 = arith.addf %161, %160 : vector<1x512xf32>
    %163 = arith.divf %161, %162 : vector<1x512xf32>
    %c4_79 = arith.constant 4 : index
    %c0_80 = arith.constant 0 : index
    %164 = memref.load %arg1[%c4_79, %c0_80] : memref<6x8xf32, #tpu.memory_space<smem>>
    %165 = vector.broadcast %164 : f32 to vector<1x512xf32>
    %166 = arith.mulf %0, %165 : vector<1x512xf32>
    %c4_81 = arith.constant 4 : index
    %c1_82 = arith.constant 1 : index
    %167 = memref.load %arg1[%c4_81, %c1_82] : memref<6x8xf32, #tpu.memory_space<smem>>
    %168 = vector.broadcast %167 : f32 to vector<1x512xf32>
    %169 = arith.mulf %1, %168 : vector<1x512xf32>
    %170 = arith.addf %166, %169 : vector<1x512xf32>
    %c4_83 = arith.constant 4 : index
    %c2_84 = arith.constant 2 : index
    %171 = memref.load %arg1[%c4_83, %c2_84] : memref<6x8xf32, #tpu.memory_space<smem>>
    %172 = vector.broadcast %171 : f32 to vector<1x512xf32>
    %173 = arith.mulf %2, %172 : vector<1x512xf32>
    %174 = arith.addf %170, %173 : vector<1x512xf32>
    %c4_85 = arith.constant 4 : index
    %c3_86 = arith.constant 3 : index
    %175 = memref.load %arg1[%c4_85, %c3_86] : memref<6x8xf32, #tpu.memory_space<smem>>
    %176 = vector.broadcast %175 : f32 to vector<1x512xf32>
    %177 = arith.mulf %3, %176 : vector<1x512xf32>
    %178 = arith.addf %174, %177 : vector<1x512xf32>
    %c4_87 = arith.constant 4 : index
    %c4_88 = arith.constant 4 : index
    %179 = memref.load %arg1[%c4_87, %c4_88] : memref<6x8xf32, #tpu.memory_space<smem>>
    %180 = vector.broadcast %179 : f32 to vector<1x512xf32>
    %181 = arith.mulf %4, %180 : vector<1x512xf32>
    %182 = arith.addf %178, %181 : vector<1x512xf32>
    %c4_89 = arith.constant 4 : index
    %c5_90 = arith.constant 5 : index
    %183 = memref.load %arg1[%c4_89, %c5_90] : memref<6x8xf32, #tpu.memory_space<smem>>
    %184 = vector.broadcast %183 : f32 to vector<1x512xf32>
    %185 = arith.mulf %5, %184 : vector<1x512xf32>
    %186 = arith.addf %182, %185 : vector<1x512xf32>
    %c4_91 = arith.constant 4 : index
    %c6_92 = arith.constant 6 : index
    %187 = memref.load %arg1[%c4_91, %c6_92] : memref<6x8xf32, #tpu.memory_space<smem>>
    %188 = vector.broadcast %187 : f32 to vector<1x512xf32>
    %189 = arith.mulf %6, %188 : vector<1x512xf32>
    %190 = arith.addf %186, %189 : vector<1x512xf32>
    %c4_93 = arith.constant 4 : index
    %c7_94 = arith.constant 7 : index
    %191 = memref.load %arg1[%c4_93, %c7_94] : memref<6x8xf32, #tpu.memory_space<smem>>
    %192 = vector.broadcast %191 : f32 to vector<1x512xf32>
    %193 = arith.mulf %7, %192 : vector<1x512xf32>
    %194 = arith.addf %190, %193 : vector<1x512xf32>
    %c4_95 = arith.constant 4 : index
    %195 = memref.load %arg2[%c4_95] : memref<6xf32, #tpu.memory_space<smem>>
    %196 = vector.broadcast %195 : f32 to vector<1x512xf32>
    %197 = arith.addf %194, %196 : vector<1x512xf32>
    %198 = arith.negf %197 : vector<1x512xf32>
    %199 = math.exp %198 : vector<1x512xf32>
    %cst_96 = arith.constant 1.000000e+00 : f32
    %200 = vector.broadcast %cst_96 : f32 to vector<1x512xf32>
    %201 = arith.addf %200, %199 : vector<1x512xf32>
    %202 = arith.divf %200, %201 : vector<1x512xf32>
    %c5_97 = arith.constant 5 : index
    %c0_98 = arith.constant 0 : index
    %203 = memref.load %arg1[%c5_97, %c0_98] : memref<6x8xf32, #tpu.memory_space<smem>>
    %204 = vector.broadcast %203 : f32 to vector<1x512xf32>
    %205 = arith.mulf %0, %204 : vector<1x512xf32>
    %c5_99 = arith.constant 5 : index
    %c1_100 = arith.constant 1 : index
    %206 = memref.load %arg1[%c5_99, %c1_100] : memref<6x8xf32, #tpu.memory_space<smem>>
    %207 = vector.broadcast %206 : f32 to vector<1x512xf32>
    %208 = arith.mulf %1, %207 : vector<1x512xf32>
    %209 = arith.addf %205, %208 : vector<1x512xf32>
    %c5_101 = arith.constant 5 : index
    %c2_102 = arith.constant 2 : index
    %210 = memref.load %arg1[%c5_101, %c2_102] : memref<6x8xf32, #tpu.memory_space<smem>>
    %211 = vector.broadcast %210 : f32 to vector<1x512xf32>
    %212 = arith.mulf %2, %211 : vector<1x512xf32>
    %213 = arith.addf %209, %212 : vector<1x512xf32>
    %c5_103 = arith.constant 5 : index
    %c3_104 = arith.constant 3 : index
    %214 = memref.load %arg1[%c5_103, %c3_104] : memref<6x8xf32, #tpu.memory_space<smem>>
    %215 = vector.broadcast %214 : f32 to vector<1x512xf32>
    %216 = arith.mulf %3, %215 : vector<1x512xf32>
    %217 = arith.addf %213, %216 : vector<1x512xf32>
    %c5_105 = arith.constant 5 : index
    %c4_106 = arith.constant 4 : index
    %218 = memref.load %arg1[%c5_105, %c4_106] : memref<6x8xf32, #tpu.memory_space<smem>>
    %219 = vector.broadcast %218 : f32 to vector<1x512xf32>
    %220 = arith.mulf %4, %219 : vector<1x512xf32>
    %221 = arith.addf %217, %220 : vector<1x512xf32>
    %c5_107 = arith.constant 5 : index
    %c5_108 = arith.constant 5 : index
    %222 = memref.load %arg1[%c5_107, %c5_108] : memref<6x8xf32, #tpu.memory_space<smem>>
    %223 = vector.broadcast %222 : f32 to vector<1x512xf32>
    %224 = arith.mulf %5, %223 : vector<1x512xf32>
    %225 = arith.addf %221, %224 : vector<1x512xf32>
    %c5_109 = arith.constant 5 : index
    %c6_110 = arith.constant 6 : index
    %226 = memref.load %arg1[%c5_109, %c6_110] : memref<6x8xf32, #tpu.memory_space<smem>>
    %227 = vector.broadcast %226 : f32 to vector<1x512xf32>
    %228 = arith.mulf %6, %227 : vector<1x512xf32>
    %229 = arith.addf %225, %228 : vector<1x512xf32>
    %c5_111 = arith.constant 5 : index
    %c7_112 = arith.constant 7 : index
    %230 = memref.load %arg1[%c5_111, %c7_112] : memref<6x8xf32, #tpu.memory_space<smem>>
    %231 = vector.broadcast %230 : f32 to vector<1x512xf32>
    %232 = arith.mulf %7, %231 : vector<1x512xf32>
    %233 = arith.addf %229, %232 : vector<1x512xf32>
    %c5_113 = arith.constant 5 : index
    %234 = memref.load %arg2[%c5_113] : memref<6xf32, #tpu.memory_space<smem>>
    %235 = vector.broadcast %234 : f32 to vector<1x512xf32>
    %236 = arith.addf %233, %235 : vector<1x512xf32>
    %237 = arith.negf %236 : vector<1x512xf32>
    %238 = math.exp %237 : vector<1x512xf32>
    %cst_114 = arith.constant 1.000000e+00 : f32
    %239 = vector.broadcast %cst_114 : f32 to vector<1x512xf32>
    %240 = arith.addf %239, %238 : vector<1x512xf32>
    %241 = arith.divf %239, %240 : vector<1x512xf32>
    %c0_115 = arith.constant 0 : index
    %c0_116 = arith.constant 0 : index
    %242 = memref.load %arg3[%c0_115, %c0_116] : memref<4x6xf32, #tpu.memory_space<smem>>
    %243 = vector.broadcast %242 : f32 to vector<1x512xf32>
    %244 = arith.mulf %46, %243 : vector<1x512xf32>
    %c0_117 = arith.constant 0 : index
    %c1_118 = arith.constant 1 : index
    %245 = memref.load %arg3[%c0_117, %c1_118] : memref<4x6xf32, #tpu.memory_space<smem>>
    %246 = vector.broadcast %245 : f32 to vector<1x512xf32>
    %247 = arith.mulf %85, %246 : vector<1x512xf32>
    %248 = arith.addf %244, %247 : vector<1x512xf32>
    %c0_119 = arith.constant 0 : index
    %c2_120 = arith.constant 2 : index
    %249 = memref.load %arg3[%c0_119, %c2_120] : memref<4x6xf32, #tpu.memory_space<smem>>
    %250 = vector.broadcast %249 : f32 to vector<1x512xf32>
    %251 = arith.mulf %124, %250 : vector<1x512xf32>
    %252 = arith.addf %248, %251 : vector<1x512xf32>
    %c0_121 = arith.constant 0 : index
    %c3_122 = arith.constant 3 : index
    %253 = memref.load %arg3[%c0_121, %c3_122] : memref<4x6xf32, #tpu.memory_space<smem>>
    %254 = vector.broadcast %253 : f32 to vector<1x512xf32>
    %255 = arith.mulf %163, %254 : vector<1x512xf32>
    %256 = arith.addf %252, %255 : vector<1x512xf32>
    %c0_123 = arith.constant 0 : index
    %c4_124 = arith.constant 4 : index
    %257 = memref.load %arg3[%c0_123, %c4_124] : memref<4x6xf32, #tpu.memory_space<smem>>
    %258 = vector.broadcast %257 : f32 to vector<1x512xf32>
    %259 = arith.mulf %202, %258 : vector<1x512xf32>
    %260 = arith.addf %256, %259 : vector<1x512xf32>
    %c0_125 = arith.constant 0 : index
    %c5_126 = arith.constant 5 : index
    %261 = memref.load %arg3[%c0_125, %c5_126] : memref<4x6xf32, #tpu.memory_space<smem>>
    %262 = vector.broadcast %261 : f32 to vector<1x512xf32>
    %263 = arith.mulf %241, %262 : vector<1x512xf32>
    %264 = arith.addf %260, %263 : vector<1x512xf32>
    %c0_127 = arith.constant 0 : index
    %265 = memref.load %arg4[%c0_127] : memref<4xf32, #tpu.memory_space<smem>>
    %266 = vector.broadcast %265 : f32 to vector<1x512xf32>
    %267 = arith.addf %264, %266 : vector<1x512xf32>
    %268 = arith.negf %267 : vector<1x512xf32>
    %269 = math.exp %268 : vector<1x512xf32>
    %cst_128 = arith.constant 1.000000e+00 : f32
    %270 = vector.broadcast %cst_128 : f32 to vector<1x512xf32>
    %271 = arith.addf %270, %269 : vector<1x512xf32>
    %272 = arith.divf %270, %271 : vector<1x512xf32>
    %c1_129 = arith.constant 1 : index
    %c0_130 = arith.constant 0 : index
    %273 = memref.load %arg3[%c1_129, %c0_130] : memref<4x6xf32, #tpu.memory_space<smem>>
    %274 = vector.broadcast %273 : f32 to vector<1x512xf32>
    %275 = arith.mulf %46, %274 : vector<1x512xf32>
    %c1_131 = arith.constant 1 : index
    %c1_132 = arith.constant 1 : index
    %276 = memref.load %arg3[%c1_131, %c1_132] : memref<4x6xf32, #tpu.memory_space<smem>>
    %277 = vector.broadcast %276 : f32 to vector<1x512xf32>
    %278 = arith.mulf %85, %277 : vector<1x512xf32>
    %279 = arith.addf %275, %278 : vector<1x512xf32>
    %c1_133 = arith.constant 1 : index
    %c2_134 = arith.constant 2 : index
    %280 = memref.load %arg3[%c1_133, %c2_134] : memref<4x6xf32, #tpu.memory_space<smem>>
    %281 = vector.broadcast %280 : f32 to vector<1x512xf32>
    %282 = arith.mulf %124, %281 : vector<1x512xf32>
    %283 = arith.addf %279, %282 : vector<1x512xf32>
    %c1_135 = arith.constant 1 : index
    %c3_136 = arith.constant 3 : index
    %284 = memref.load %arg3[%c1_135, %c3_136] : memref<4x6xf32, #tpu.memory_space<smem>>
    %285 = vector.broadcast %284 : f32 to vector<1x512xf32>
    %286 = arith.mulf %163, %285 : vector<1x512xf32>
    %287 = arith.addf %283, %286 : vector<1x512xf32>
    %c1_137 = arith.constant 1 : index
    %c4_138 = arith.constant 4 : index
    %288 = memref.load %arg3[%c1_137, %c4_138] : memref<4x6xf32, #tpu.memory_space<smem>>
    %289 = vector.broadcast %288 : f32 to vector<1x512xf32>
    %290 = arith.mulf %202, %289 : vector<1x512xf32>
    %291 = arith.addf %287, %290 : vector<1x512xf32>
    %c1_139 = arith.constant 1 : index
    %c5_140 = arith.constant 5 : index
    %292 = memref.load %arg3[%c1_139, %c5_140] : memref<4x6xf32, #tpu.memory_space<smem>>
    %293 = vector.broadcast %292 : f32 to vector<1x512xf32>
    %294 = arith.mulf %241, %293 : vector<1x512xf32>
    %295 = arith.addf %291, %294 : vector<1x512xf32>
    %c1_141 = arith.constant 1 : index
    %296 = memref.load %arg4[%c1_141] : memref<4xf32, #tpu.memory_space<smem>>
    %297 = vector.broadcast %296 : f32 to vector<1x512xf32>
    %298 = arith.addf %295, %297 : vector<1x512xf32>
    %299 = arith.negf %298 : vector<1x512xf32>
    %300 = math.exp %299 : vector<1x512xf32>
    %cst_142 = arith.constant 1.000000e+00 : f32
    %301 = vector.broadcast %cst_142 : f32 to vector<1x512xf32>
    %302 = arith.addf %301, %300 : vector<1x512xf32>
    %303 = arith.divf %301, %302 : vector<1x512xf32>
    %c2_143 = arith.constant 2 : index
    %c0_144 = arith.constant 0 : index
    %304 = memref.load %arg3[%c2_143, %c0_144] : memref<4x6xf32, #tpu.memory_space<smem>>
    %305 = vector.broadcast %304 : f32 to vector<1x512xf32>
    %306 = arith.mulf %46, %305 : vector<1x512xf32>
    %c2_145 = arith.constant 2 : index
    %c1_146 = arith.constant 1 : index
    %307 = memref.load %arg3[%c2_145, %c1_146] : memref<4x6xf32, #tpu.memory_space<smem>>
    %308 = vector.broadcast %307 : f32 to vector<1x512xf32>
    %309 = arith.mulf %85, %308 : vector<1x512xf32>
    %310 = arith.addf %306, %309 : vector<1x512xf32>
    %c2_147 = arith.constant 2 : index
    %c2_148 = arith.constant 2 : index
    %311 = memref.load %arg3[%c2_147, %c2_148] : memref<4x6xf32, #tpu.memory_space<smem>>
    %312 = vector.broadcast %311 : f32 to vector<1x512xf32>
    %313 = arith.mulf %124, %312 : vector<1x512xf32>
    %314 = arith.addf %310, %313 : vector<1x512xf32>
    %c2_149 = arith.constant 2 : index
    %c3_150 = arith.constant 3 : index
    %315 = memref.load %arg3[%c2_149, %c3_150] : memref<4x6xf32, #tpu.memory_space<smem>>
    %316 = vector.broadcast %315 : f32 to vector<1x512xf32>
    %317 = arith.mulf %163, %316 : vector<1x512xf32>
    %318 = arith.addf %314, %317 : vector<1x512xf32>
    %c2_151 = arith.constant 2 : index
    %c4_152 = arith.constant 4 : index
    %319 = memref.load %arg3[%c2_151, %c4_152] : memref<4x6xf32, #tpu.memory_space<smem>>
    %320 = vector.broadcast %319 : f32 to vector<1x512xf32>
    %321 = arith.mulf %202, %320 : vector<1x512xf32>
    %322 = arith.addf %318, %321 : vector<1x512xf32>
    %c2_153 = arith.constant 2 : index
    %c5_154 = arith.constant 5 : index
    %323 = memref.load %arg3[%c2_153, %c5_154] : memref<4x6xf32, #tpu.memory_space<smem>>
    %324 = vector.broadcast %323 : f32 to vector<1x512xf32>
    %325 = arith.mulf %241, %324 : vector<1x512xf32>
    %326 = arith.addf %322, %325 : vector<1x512xf32>
    %c2_155 = arith.constant 2 : index
    %327 = memref.load %arg4[%c2_155] : memref<4xf32, #tpu.memory_space<smem>>
    %328 = vector.broadcast %327 : f32 to vector<1x512xf32>
    %329 = arith.addf %326, %328 : vector<1x512xf32>
    %330 = arith.negf %329 : vector<1x512xf32>
    %331 = math.exp %330 : vector<1x512xf32>
    %cst_156 = arith.constant 1.000000e+00 : f32
    %332 = vector.broadcast %cst_156 : f32 to vector<1x512xf32>
    %333 = arith.addf %332, %331 : vector<1x512xf32>
    %334 = arith.divf %332, %333 : vector<1x512xf32>
    %c3_157 = arith.constant 3 : index
    %c0_158 = arith.constant 0 : index
    %335 = memref.load %arg3[%c3_157, %c0_158] : memref<4x6xf32, #tpu.memory_space<smem>>
    %336 = vector.broadcast %335 : f32 to vector<1x512xf32>
    %337 = arith.mulf %46, %336 : vector<1x512xf32>
    %c3_159 = arith.constant 3 : index
    %c1_160 = arith.constant 1 : index
    %338 = memref.load %arg3[%c3_159, %c1_160] : memref<4x6xf32, #tpu.memory_space<smem>>
    %339 = vector.broadcast %338 : f32 to vector<1x512xf32>
    %340 = arith.mulf %85, %339 : vector<1x512xf32>
    %341 = arith.addf %337, %340 : vector<1x512xf32>
    %c3_161 = arith.constant 3 : index
    %c2_162 = arith.constant 2 : index
    %342 = memref.load %arg3[%c3_161, %c2_162] : memref<4x6xf32, #tpu.memory_space<smem>>
    %343 = vector.broadcast %342 : f32 to vector<1x512xf32>
    %344 = arith.mulf %124, %343 : vector<1x512xf32>
    %345 = arith.addf %341, %344 : vector<1x512xf32>
    %c3_163 = arith.constant 3 : index
    %c3_164 = arith.constant 3 : index
    %346 = memref.load %arg3[%c3_163, %c3_164] : memref<4x6xf32, #tpu.memory_space<smem>>
    %347 = vector.broadcast %346 : f32 to vector<1x512xf32>
    %348 = arith.mulf %163, %347 : vector<1x512xf32>
    %349 = arith.addf %345, %348 : vector<1x512xf32>
    %c3_165 = arith.constant 3 : index
    %c4_166 = arith.constant 4 : index
    %350 = memref.load %arg3[%c3_165, %c4_166] : memref<4x6xf32, #tpu.memory_space<smem>>
    %351 = vector.broadcast %350 : f32 to vector<1x512xf32>
    %352 = arith.mulf %202, %351 : vector<1x512xf32>
    %353 = arith.addf %349, %352 : vector<1x512xf32>
    %c3_167 = arith.constant 3 : index
    %c5_168 = arith.constant 5 : index
    %354 = memref.load %arg3[%c3_167, %c5_168] : memref<4x6xf32, #tpu.memory_space<smem>>
    %355 = vector.broadcast %354 : f32 to vector<1x512xf32>
    %356 = arith.mulf %241, %355 : vector<1x512xf32>
    %357 = arith.addf %353, %356 : vector<1x512xf32>
    %c3_169 = arith.constant 3 : index
    %358 = memref.load %arg4[%c3_169] : memref<4xf32, #tpu.memory_space<smem>>
    %359 = vector.broadcast %358 : f32 to vector<1x512xf32>
    %360 = arith.addf %357, %359 : vector<1x512xf32>
    %361 = arith.negf %360 : vector<1x512xf32>
    %362 = math.exp %361 : vector<1x512xf32>
    %cst_170 = arith.constant 1.000000e+00 : f32
    %363 = vector.broadcast %cst_170 : f32 to vector<1x512xf32>
    %364 = arith.addf %363, %362 : vector<1x512xf32>
    %365 = arith.divf %363, %364 : vector<1x512xf32>
    %c0_171 = arith.constant 0 : index
    %c0_172 = arith.constant 0 : index
    %366 = memref.load %arg5[%c0_171, %c0_172] : memref<1x4xf32, #tpu.memory_space<smem>>
    %367 = vector.broadcast %366 : f32 to vector<1x512xf32>
    %368 = arith.mulf %272, %367 : vector<1x512xf32>
    %c0_173 = arith.constant 0 : index
    %c1_174 = arith.constant 1 : index
    %369 = memref.load %arg5[%c0_173, %c1_174] : memref<1x4xf32, #tpu.memory_space<smem>>
    %370 = vector.broadcast %369 : f32 to vector<1x512xf32>
    %371 = arith.mulf %303, %370 : vector<1x512xf32>
    %372 = arith.addf %368, %371 : vector<1x512xf32>
    %c0_175 = arith.constant 0 : index
    %c2_176 = arith.constant 2 : index
    %373 = memref.load %arg5[%c0_175, %c2_176] : memref<1x4xf32, #tpu.memory_space<smem>>
    %374 = vector.broadcast %373 : f32 to vector<1x512xf32>
    %375 = arith.mulf %334, %374 : vector<1x512xf32>
    %376 = arith.addf %372, %375 : vector<1x512xf32>
    %c0_177 = arith.constant 0 : index
    %c3_178 = arith.constant 3 : index
    %377 = memref.load %arg5[%c0_177, %c3_178] : memref<1x4xf32, #tpu.memory_space<smem>>
    %378 = vector.broadcast %377 : f32 to vector<1x512xf32>
    %379 = arith.mulf %365, %378 : vector<1x512xf32>
    %380 = arith.addf %376, %379 : vector<1x512xf32>
    %c0_179 = arith.constant 0 : index
    %381 = memref.load %arg6[%c0_179] : memref<1xf32, #tpu.memory_space<smem>>
    %382 = vector.broadcast %381 : f32 to vector<1x512xf32>
    %383 = arith.addf %380, %382 : vector<1x512xf32>
    %384 = arith.negf %383 : vector<1x512xf32>
    %385 = math.exp %384 : vector<1x512xf32>
    %cst_180 = arith.constant 1.000000e+00 : f32
    %386 = vector.broadcast %cst_180 : f32 to vector<1x512xf32>
    %387 = arith.addf %386, %385 : vector<1x512xf32>
    %388 = arith.divf %386, %387 : vector<1x512xf32>
    %c0_181 = arith.constant 0 : index
    %c0_182 = arith.constant 0 : index
    %389 = vector.load %arg8[%c0_181, %c0_182] : memref<1x512xf32, #tpu.memory_space<vmem>>, vector<1x512xf32>
    tpu.vector_store %arg8[%c0_181, %c0_182], %388 {strides = array<i32>} : memref<1x512xf32, #tpu.memory_space<vmem>>, vector<1x512xf32>,
    return
  }
  func.func @transform_0(%arg0: i32) -> (i32, i32) {
    %c0_i32 = arith.constant 0 : i32
    %c0_i32_0 = arith.constant 0 : i32
    %c0_i32_1 = arith.constant 0 : i32
    return %c0_i32, %c0_i32_0 : i32, i32
  }
  func.func @transform_1(%arg0: i32) -> i32 {
    %c0_i32 = arith.constant 0 : i32
    %c0_i32_0 = arith.constant 0 : i32
    return %c0_i32 : i32
  }
  func.func @transform_2(%arg0: i32) -> (i32, i32) {
    %c0_i32 = arith.constant 0 : i32
    %c0_i32_0 = arith.constant 0 : i32
    %c0_i32_1 = arith.constant 0 : i32
    return %c0_i32, %c0_i32_0 : i32, i32
  }
  func.func @transform_3(%arg0: i32) -> i32 {
    %c0_i32 = arith.constant 0 : i32
    %c0_i32_0 = arith.constant 0 : i32
    return %c0_i32 : i32
  }
  func.func @transform_4(%arg0: i32) -> (i32, i32) {
    %c0_i32 = arith.constant 0 : i32
    %c0_i32_0 = arith.constant 0 : i32
    %c0_i32_1 = arith.constant 0 : i32
    return %c0_i32, %c0_i32_0 : i32, i32
  }
  func.func @transform_5(%arg0: i32) -> i32 {
    %c0_i32 = arith.constant 0 : i32
    %c0_i32_0 = arith.constant 0 : i32
    return %c0_i32 : i32
  }
  func.func @transform_6(%arg0: i32) -> (i32, i32) {
    %c0_i32 = arith.constant 0 : i32
    %c0_i32_0 = arith.constant 0 : i32
    return %c0_i32, %arg0 : i32, i32
  }
  func.func @transform_7(%arg0: i32) -> (i32, i32) {
    %c0_i32 = arith.constant 0 : i32
    %c0_i32_0 = arith.constant 0 : i32
    return %c0_i32, %arg0 : i32, i32
  }
}

</mosaic_0001>

<bundles_post_ra>
// kernel: tpu_custom_call.1
= control target key start
LH: loop header
LB: loop body
LE: loop exit
PB: predicated region body
PF: predicated region fallthrough
CT: control target
= control target key end

     0   :  { %s2179_s0 = inlined_call_operand.hbm [shape: f32[6,8], index: 0, kind: input, shape index: {}]   ;;  %s2180_s1 = inlined_call_operand.vmem [shape: f32[6], index: 1, kind: input, shape index: {}]   ;;  %s2181_s2 = inlined_call_operand.hbm [shape: f32[4,6], index: 2, kind: input, shape index: {}]   ;;  %s2182_s3 = inlined_call_operand.vmem [shape: f32[4], index: 3, kind: input, shape index: {}]   ;;  %s2183_s4 = inlined_call_operand.vmem [shape: f32[1,4], index: 4, kind: input, shape index: {}]   ;;  %s2184_s5 = inlined_call_operand.<no memory space> [shape: f32[1], index: 5, kind: input, shape index: {}]   ;;  %s2185_s6 = inlined_call_operand.hbm [shape: f32[8,1024], index: 6, kind: input, shape index: {}]   ;;  %s2186_s7 = inlined_call_operand.hbm [shape: f32[1,1024], index: 7, kind: output, shape index: {}]  }
   0x1   :  { %12 = sst [smem:[#allocation2]] %s2184_s5 }
   0x2   :  { %13 = vsyncpa [#allocation6], 0 }
   0x3   :  { %14 = vsyncpa [#allocation7], 0 }
   0x4   :  { %15 = vsyncpa [#allocation10], 0 }
   0x5   :  { %16 = vsyncpa [#allocation12], 0 }
   0x6   :  { %17 = vsyncpa [#allocation4], 0 }
   0x7   :  { %19 = vsyncpa [#allocation4 + $0x1], 0 }
   0x8   :  { %20 = vsyncpa [#allocation5], 0 }
   0x9   :  { %22 = vsyncpa [#allocation5 + $0x1], 0  ;;  %s1560_s26 = smov 0   ;;  %s1562_s27 = smov 0  }
   0xa   :  { %s1564_s28 = smov 0   ;;  %s1566_s29 = smov 0  }
   0xb LB: > { %s253_s8 = sshll.u32 %s2182_s3, 4  ;;  %s1584_s9 = sadd.s32 4294967295, %s1510_s29   ;;  %s1510_s29 = sphi %s1566_s29, %s2221_s29   ;;  %s1506_s28 = sphi %s1564_s28, %s2220_s28   ;;  %s1502_s27 = sphi %s1562_s27, %s2219_s27   ;;  %s1498_s26 = sphi %s1560_s26, %s2218_s26   ;;  %s254_s8 = int_to_ptr.vmem [resolvable:$true] %s253_s8 }
   0xc   : > { %p1060_p0 = scmp.ge.s32.totalorder %s1510_s29, 1  ;;  %p175_p1 = scmp.eq.s32.totalorder %s1584_s9, 0 }
   0xd   : > { %p211_p2 = scmp.lt.s32.totalorder %s1510_s29, 3  ;;  %s223_s13 = sshll.u32 %s2179_s0, 4  ;;  %s224_s13 = int_to_ptr.hbm [resolvable:$true] %s223_s13 }
   0xe   : > { %s233_s16 = sshll.u32 %s2180_s1, 4  ;;  %s243_s20 = sshll.u32 %s2181_s2, 4  ;;  %s234_s16 = int_to_ptr.vmem [resolvable:$true] %s233_s16  ;;  %s244_s20 = int_to_ptr.hbm [resolvable:$true] %s243_s20 }
   0xf   : > { %p1589_p3 = pnand %p1060_p0, %p211_p2  ;;  %s1512_s21 = smov [#allocation11]  }
  0x10   : > { %s1513_s22 = smov [#allocation3]   ;;  %s1514_s23 = smov [#allocation8]  }
  0x11   : > { %p1206_p5 = pneg %p1589_p3  ;;  %s1515_s24 = smov [#allocation9]  }
  0x12   : > { %s263_s30 = sshll.u32 %s2183_s4, 4  ;;  %s1059_s11 = sadd.s32 4294967294, %s1510_s29   ;;  %s264_s30 = int_to_ptr.vmem [resolvable:$true] %s263_s30 }
  0x13   : > { %p1604_p6 = pnand %p1206_p5, %p175_p1  ;;  %s1626_s12 = sadd.s32 1, %s1510_s29  }
  0x14   : > { %s158_s14 = ssub.s32 %s1510_s29, %s1626_s12  ;;  %p168_p7 = scmp.ne.s32.totalorder %s1506_s28, %s1502_s27 }
  0x15   : > { %1218 = dma.vmem_to_smem (!%p1604_p6), %s254_s8, 16, %s1512_s21, [#allocation12]  }
  0x16   : > { %1209 = dma.hbm_to_smem (!%p1604_p6), %s224_s13, 128, %s1513_s22, [#allocation6]  }
  0x17   : > { %1212 = dma.vmem_to_smem (!%p1604_p6), %s234_s16, 16, %s1514_s23, [#allocation7]  }
  0x18   : > { %1215 = dma.hbm_to_smem (!%p1604_p6), %s244_s20, 64, %s1515_s24, [#allocation10]  }
  0x19   : > { %s1516_s8 = smov [#allocation13]   ;;  %s161_s13 = sadd.s32 1, %s1506_s28 }
  0x1a   : > { %1221 = dma.vmem_to_smem (!%p1604_p6), %s264_s30, 16, %s1516_s8, [#allocation12]  }
  0x1b   : > { %p159_p8 = scmp.eq.s32.totalorder %s158_s14, 0  ;;  %p169_p9 = scmp.eq.s32.totalorder %s1510_s29, 0 }
  0x1c   : > { %p174_p10 = scmp.ne.s32.totalorder %s1502_s27, %s1498_s26  ;;  %p198_p11 = scmp.eq.s32.totalorder %s1584_s9, 1 }
  0x1d   : > { %s1638_s15 = scalar_select %p159_p8, %s1506_s28, %s161_s13  }
  0x1e   : > { %p1642_p12 = por %p175_p1, %p174_p10  ;;  %p1646_p13 = por %p198_p11, %p168_p7 }
  0x1f   : > { %p204_p0 = scmp.eq.s32.totalorder %s1059_s11, 1  ;;  %p170_p2 = por %p169_p9, %p168_p7 }
  0x20   : > { %s277_s18 = sand.u32 1, %s1506_s28   ;;  %p1235_p6 = scmp.lt.s32.totalorder %s1510_s29, 2 }
  0x21   : > { %p1651_p5 = por %p204_p0, %p174_p10  ;;  %s1067_s20 = sshll.u32 %s277_s18, 5 }
  0x22   : > { %s1181_s21 = sshll.u32 %s1510_s29, 5  ;;  %s281_s5 = scalar_lea.vmem [#allocation14], %s1067_s20 }
  0x23   : > { %s286_s24 = scalar_lea.hbm %s2185_s6, %s1181_s21  ;;  %s290_s30 = sshll.u32 %s281_s5, 4  ;;  %s291_s30 = int_to_ptr.vmem [resolvable:$true] %s290_s30 }
  0x24   : > { %s288_s25 = sshll.u32 %s286_s24, 4  ;;  %p1660_p8 = pnand %p1235_p6, %p170_p2  ;;  %s289_s25 = int_to_ptr.hbm [resolvable:$true] %s288_s25 }
  0x25   : > { %s278_s11 = scalar_lea.sflag [#allocation4], %s277_s18  ;;  %s1398_s13 = sshra.s32 %s289_s25, 4  ;;  %s1399_s13 = int_to_ptr.hbm [resolvable:$true] %s1398_s13 }
  0x26   : > { %s1400_s14 = scalar_lea.hbm %s1399_s13, 32  ;;  %p1402_p9 = pneg %p1660_p8 }
  0x27   : > { %p1401_p7 = scmp.ne.s32.totalorder %s1399_s13, %s1400_s14  ;;  %s1405_s20 = scalar_lea.hbm %s2185_s6, 64 }
  0x28   : > { %p1406_p0 = scmp.lt.s32.totalorder %s1399_s13, %s2185_s6  ;;  %p1407_p2 = scmp.lt.s32.totalorder %s1405_s20, %s1400_s14 }
  0x29   : > { %p1403_p10 = pnand %p1402_p9, %p1401_p7 }
  0x2a   : > { %p1408_p6 = por %p1407_p2, %p1406_p0 }
  0x2b   : > { %p1404_p11 = pneg %p1403_p10 }
  0x2d   : > { %p1409_p4 = pnand %p1408_p6, %p1404_p11 }
  0x2f   : > { %1412 = shalt.err (!%p1409_p4)
}
  0x30   : > { %1225 = dma.hbm_to_vmem [thread:$0]  (!%p1660_p8), %s289_s25, 512, %s291_s30, %s278_s11  }
  0x31   : > { %299 = sbr.rel (%p1589_p3) target bundleno = 244 (0xf4), region = 48 }
  0x36   : > { %1473 = dma.done.wait (%p175_p1), [#allocation6], 128  }
  0x37   : > { %1475 = vsyncadd (%p175_p1), [#allocation6], 4294967168 }
  0x38   : > { %1477 = dma.done.wait (%p175_p1), [#allocation7], 16  }
  0x39   : > { %1479 = vsyncadd (%p175_p1), [#allocation7], 4294967280 }
  0x3a   : > { %1481 = dma.done.wait (%p175_p1), [#allocation10], 64  }
  0x3b   : > { %1483 = vsyncadd (%p175_p1), [#allocation10], 4294967232 }
  0x3c   : > { %1485 = dma.done.wait (%p175_p1), [#allocation12], 32  }
  0x3d   : > { %1487 = vsyncadd (%p175_p1), [#allocation12], 4294967264  ;;  %s1693_s10 = sand.u32 1, %s1502_s27  }
  0x3e   : > { %s1076_s18 = sshll.u32 %s1693_s10, 5  ;;  %s327_s25 = scalar_lea.sflag [#allocation4], %s1693_s10 }
  0x3f   : > { %s1697_s5 = scalar_lea.vmem [#allocation14], %s1076_s18 }
  0x40   : > { %1489 = dma.done.wait (%p1642_p12), %s327_s25, 512  }
  0x41   : > { %1491 = vsyncadd (%p1642_p12), %s327_s25, 4294966784 }
  0x42   : > { %336 = sfence }
  0x43   : > { %s380_s30 = sld [smem:[#allocation3]]  ;;  %v1704_v0 = vld [vmem:[%s1697_s5] ss:$8 sm:$0xf] }
  0x44   : > { %s1085_s8 = sld [smem:[#allocation3 + $0x1]]  ;;  %v1707_v1 = vld [vmem:[%s1697_s5 + $0x1] ss:$8 sm:$0xf] }
  0x45   : > { %s1086_s11 = sld [smem:[#allocation3 + $0x2]]  ;;  %v1712_v6 = vld [vmem:[%s1697_s5 + $0x2] ss:$8 sm:$0xf] }
  0x46   : > { %s1087_s13 = sld [smem:[#allocation3 + $0x3]]  ;;  %v1715_v7 = vld [vmem:[%s1697_s5 + $0x3] ss:$8 sm:$0xf] }
  0x47   : > { %s1088_s16 = sld [smem:[#allocation3 + $0x4]]  ;;  %v1720_v9 = vld [vmem:[%s1697_s5 + $0x4] ss:$8 sm:$0xf] }
  0x48   : > { %s1089_s14 = sld [smem:[#allocation3 + $0x5]]  ;;  %v1726_v13 = vld [vmem:[%s1697_s5 + $0x5] ss:$8 sm:$0xf] }
  0x49   : > { %v381_v2 = vstv %s380_s30  ;;  %s1090_s21 = sld [smem:[#allocation3 + $0x6]]  ;;  %v1731_v19 = vld [vmem:[%s1697_s5 + $0x6] ss:$8 sm:$0xf] }
  0x4a   : > { %v382_v3 = vmul.f32 %v381_v2, %v1704_v0  ;;  %v384_v4 = vstv %s1085_s8  ;;  %s1717_s22 = sld [smem:[#allocation3 + $0x7]]  ;;  %v1735_v23 = vld [vmem:[%s1697_s5 + $0x7] ss:$8 sm:$0xf] }
  0x4b   : > { %v385_v5 = vmul.f32 %v1707_v1, %v384_v4  ;;  %v388_v10 = vstv %s1086_s11  ;;  %s1722_s20 = sld [smem:[#allocation8]] }
  0x4c   : > { %v389_v11 = vmul.f32 %v1712_v6, %v388_v10  ;;  %v392_v12 = vstv %s1087_s13  ;;  %s1093_s23 = sld [smem:[#allocation3 + $0x80]] }
  0x4d   : > { %v386_v8 = vadd.f32 %v385_v5, %v382_v3  ;;  %v393_v14 = vmul.f32 %v1715_v7, %v392_v12  ;;  %v396_v15 = vstv %s1088_s16  ;;  %s1094_s24 = sld [smem:[#allocation3 + $0x81]] }
  0x4e   : > { %v397_v17 = vmul.f32 %v1720_v9, %v396_v15  ;;  %v400_v18 = vstv %s1089_s14  ;;  %s1095_s18 = sld [smem:[#allocation3 + $0x82]] }
  0x4f   : > { %v390_v16 = vadd.f32 %v389_v11, %v386_v8  ;;  %v404_v20 = vstv %s1090_s21  ;;  %s1096_s25 = sld [smem:[#allocation3 + $0x83]]  ;;  %v401_v22 = vmul.f32 %v1726_v13, %v400_v18 }
  0x50   : > { %s1097_s30 = sld [smem:[#allocation3 + $0x84]]  ;;  %v408_v24 = vstv %s1717_s22  ;;  %v405_v26 = vmul.f32 %v1731_v19, %v404_v20 }
  0x51   : > { %v394_v21 = vadd.f32 %v393_v14, %v390_v16  ;;  %s1738_s8 = sld [smem:[#allocation3 + $0x85]]  ;;  %v409_v31 = vmul.f32 %v1735_v23, %v408_v24  ;;  %v412_v40 = vstv %s1722_s20 }
  0x52   : > { %v434_v27 = vstv %s1093_s23  ;;  %s1099_s11 = sld [smem:[#allocation3 + $0x86]] }
  0x53   : > { %v398_v25 = vadd.f32 %v397_v17, %v394_v21  ;;  %v435_v28 = vmul.f32 %v434_v27, %v1704_v0  ;;  %v437_v29 = vstv %s1094_s24  ;;  %s1742_s13 = sld [smem:[#allocation3 + $0x87]] }
  0x54   : > { %v438_v32 = vmul.f32 %v1707_v1, %v437_v29  ;;  %v441_v33 = vstv %s1095_s18  ;;  %s1746_s5 = sld [smem:[#allocation8 + $0x1]] }
  0x55   : > { %v402_v30 = vadd.f32 %v401_v22, %v398_v25  ;;  %v442_v34 = vmul.f32 %v1712_v6, %v441_v33  ;;  %v445_v35 = vstv %s1096_s25  ;;  %s1103_s16 = sld [smem:[#allocation3 + $0x100]] }
  0x56   : > { %v439_v37 = vadd.f32 %v438_v32, %v435_v28  ;;  %v446_v38 = vmul.f32 %v1715_v7, %v445_v35  ;;  %v449_v39 = vstv %s1097_s30  ;;  %s1104_s14 = sld [smem:[#allocation3 + $0x101]] }
  0x57   : > { %v406_v36 = vadd.f32 %v405_v26, %v402_v30  ;;  %v453_v41 = vstv %s1738_s8  ;;  %s1105_s21 = sld [smem:[#allocation3 + $0x102]]  ;;  %v450_v44 = vmul.f32 %v1720_v9, %v449_v39 }
  0x58   : > { %v443_v43 = vadd.f32 %v442_v34, %v439_v37  ;;  %v457_v45 = vstv %s1099_s11  ;;  %s1106_s22 = sld [smem:[#allocation3 + $0x103]]  ;;  %v454_v48 = vmul.f32 %v1726_v13, %v453_v41 }
  0x59   : > { %v410_v42 = vadd.f32 %v409_v31, %v406_v36  ;;  %s1753_s23 = sld [smem:[#allocation3 + $0x104]]  ;;  %v458_v49 = vmul.f32 %v1731_v19, %v457_v45  ;;  %v461_v50 = vstv %s1742_s13 }
  0x5a   : > { %v447_v47 = vadd.f32 %v446_v38, %v443_v43  ;;  %s1756_s24 = sld [smem:[#allocation3 + $0x105]]  ;;  %v462_v59 = vmul.f32 %v1735_v23, %v461_v50  ;;  %v465_v4 = vstv %s1746_s5 }
  0x5b   : > { %v413_v46 = vadd.f32 %v412_v40, %v410_v42  ;;  %v487_v51 = vstv %s1103_s16  ;;  %s1760_s20 = sld [smem:[#allocation3 + $0x106]] }
  0x5c   : > { %v451_v53 = vadd.f32 %v450_v44, %v447_v47  ;;  %v488_v54 = vmul.f32 %v487_v51, %v1704_v0  ;;  %v490_v55 = vstv %s1104_s14  ;;  %s1763_s18 = sld [smem:[#allocation3 + $0x107]] }
  0x5d   : > { %v1092_v52 = vmul.f32 -1.442695, %v413_v46  ;;  %v491_v56 = vmul.f32 %v1707_v1, %v490_v55  ;;  %v494_v57 = vstv %s1105_s21  ;;  %s1766_s25 = sld [smem:[#allocation8 + $0x2]] }
  0x5e   : > { %v455_v58 = vadd.f32 %v454_v48, %v451_v53  ;;  %v495_v60 = vmul.f32 %v1712_v6, %v494_v57  ;;  %v498_v61 = vstv %s1106_s22  ;;  %s1113_s30 = sld [smem:[#allocation3 + $0x180]] }
  0x5f   : > { %v492_v62 = vadd.f32 %v491_v56, %v488_v54  ;;  %v499_v63 = vmul.f32 %v1715_v7, %v498_v61  ;;  %v502_v2 = vstv %s1753_s23  ;;  %s1114_s8 = sld [smem:[#allocation3 + $0x181]]  ;;  %1279 = vpow2.f32 %v1092_v52 }
  0x60   : > { %v459_v3 = vadd.f32 %v458_v49, %v455_v58  ;;  %s1115_s11 = sld [smem:[#allocation3 + $0x182]]  ;;  %v503_v8 = vmul.f32 %v1720_v9, %v502_v2  ;;  %v506_v10 = vstv %s1756_s24 }
  0x61   : > { %v496_v5 = vadd.f32 %v495_v60, %v492_v62  ;;  %s1775_s13 = sld [smem:[#allocation3 + $0x183]]  ;;  %v510_v14 = vstv %s1760_s20  ;;  %v507_v16 = vmul.f32 %v1726_v13, %v506_v10 }
  0x62   : > { %v463_v11 = vadd.f32 %v462_v59, %v459_v3  ;;  %s1777_s16 = sld [smem:[#allocation3 + $0x184]]  ;;  %v514_v17 = vstv %s1763_s18  ;;  %v511_v26 = vmul.f32 %v1731_v19, %v510_v14 }
  0x63   : > { %v500_v12 = vadd.f32 %v499_v63, %v496_v5  ;;  %s1780_s14 = sld [smem:[#allocation3 + $0x185]]  ;;  %v515_v29 = vmul.f32 %v1735_v23, %v514_v17  ;;  %v518_v40 = vstv %s1766_s25 }
  0x64   : > { %v466_v15 = vadd.f32 %v465_v4, %v463_v11  ;;  %v540_v18 = vstv %s1113_s30  ;;  %s1784_s21 = sld [smem:[#allocation3 + $0x186]] }
  0x65   : > { %v504_v20 = vadd.f32 %v503_v8, %v500_v12  ;;  %v541_v21 = vmul.f32 %v540_v18, %v1704_v0  ;;  %v543_v22 = vstv %s1114_s8  ;;  %s1787_s5 = sld [smem:[#allocation3 + $0x187]]  ;;  %v1280_v24 = vpop.eup %1279 }
  0x66   : > { %v1102_v25 = vmul.f32 -1.442695, %v466_v15  ;;  %v544_v27 = vmul.f32 %v1707_v1, %v543_v22  ;;  %v547_v28 = vstv %s1115_s11  ;;  %s1792_s22 = sld [smem:[#allocation3 + $0x200]]  ;;  %v1797_v33 = vadd.f32 1.0, %v1280_v24 }
  0x67   : > { %v508_v30 = vadd.f32 %v507_v16, %v504_v20  ;;  %v548_v32 = vmul.f32 %v1712_v6, %v547_v28  ;;  %s1795_s23 = sld [smem:[#allocation3 + $0x201]]  ;;  %v551_v34 = vstv %s1775_s13 }
  0x68   : > { %1281 = vpow2.f32 %v1102_v25  ;;  %v545_v31 = vadd.f32 %v544_v27, %v541_v21  ;;  %v555_v35 = vstv %s1777_s16  ;;  %s1801_s24 = sld [smem:[#allocation3 + $0x202]]  ;;  %v552_v38 = vmul.f32 %v1715_v7, %v551_v34 }
  0x69   : > { %v512_v36 = vadd.f32 %v511_v26, %v508_v30  ;;  %v556_v39 = vmul.f32 %v1720_v9, %v555_v35  ;;  %s1805_s20 = sld [smem:[#allocation8 + $0x3]]  ;;  %v559_v41 = vstv %s1780_s14  ;;  %1283 = vrcp.f32 %v1797_v33 }
  0x6a   : > { %v549_v37 = vadd.f32 %v548_v32, %v545_v31  ;;  %v563_v42 = vstv %s1784_s21  ;;  %s1810_s18 = sld [smem:[#allocation3 + $0x203]]  ;;  %v560_v45 = vmul.f32 %v1726_v13, %v559_v41  ;;  %vm423_vm0 = vweird.f32 %v1797_v33 }
  0x6b   : > { %v516_v43 = vadd.f32 %v515_v29, %v512_v36  ;;  %v567_v46 = vstv %s1787_s5  ;;  %s1814_s30 = sld [smem:[#allocation3 + $0x204]]  ;;  %v564_v51 = vmul.f32 %v1731_v19, %v563_v42 }
  0x6c   : > { %v553_v44 = vadd.f32 %v552_v38, %v549_v37  ;;  %v593_v47 = vstv %s1792_s22  ;;  %s1817_s8 = sld [smem:[#allocation3 + $0x205]]  ;;  %v568_v53 = vmul.f32 %v1735_v23, %v567_v46 }
  0x6d   : > { %v519_v49 = vadd.f32 %v518_v40, %v516_v43  ;;  %s1821_s25 = sld [smem:[#allocation3 + $0x206]]  ;;  %v594_v54 = vmul.f32 %v593_v47, %v1704_v0  ;;  %v596_v55 = vstv %s1795_s23 }
  0x6e   : > { %v1282_v48 = vpop.eup %1281  ;;  %v557_v50 = vadd.f32 %v556_v39, %v553_v44  ;;  %s1828_s11 = sld [smem:[#allocation3 + $0x207]]  ;;  %v597_v58 = vmul.f32 %v1707_v1, %v596_v55  ;;  %v600_v59 = vstv %s1801_s24 }
  0x6f   : > { %v1823_v52 = vadd.f32 1.0, %v1282_v48  ;;  %v1112_v56 = vmul.f32 -1.442695, %v519_v49  ;;  %s1832_s13 = sld [smem:[#allocation3 + $0x280]]  ;;  %v571_v62 = vstv %s1805_s20  ;;  %v601_v63 = vmul.f32 %v1712_v6, %v600_v59  ;;  %v1842_v3 = vpop.eup %1283 }
  0x70   : > { %v561_v57 = vadd.f32 %v560_v45, %v557_v50  ;;  %s1835_s16 = sld [smem:[#allocation3 + $0x281]]  ;;  %v598_v61 = vadd.f32 %v597_v58, %v594_v54  ;;  %v604_v2 = vstv %s1810_s18  ;;  %v419_v16 = vmul.f32 %v1842_v3, %v1797_v33 }
  0x71   : > { %1285 = vrcp.f32 %v1823_v52  ;;  %s1840_s14 = sld [smem:[#allocation8 + $0x4]]  ;;  %v605_v5 = vmul.f32 %v1715_v7, %v604_v2  ;;  %v608_v8 = vstv %s1814_s30  ;;  %vm424_vm1 = vweird.f32 %v1842_v3 }
  0x72   : > { %1287 = vpow2.f32 %v1112_v56  ;;  %v565_v60 = vadd.f32 %v564_v51, %v561_v57  ;;  %s1846_s21 = sld [smem:[#allocation3 + $0x282]]  ;;  %v602_v10 = vadd.f32 %v601_v63, %v598_v61  ;;  %v609_v11 = vmul.f32 %v1720_v9, %v608_v8  ;;  %vm1915_vm4 = vmor %vm423_vm0, %vm424_vm1 }
  0x73   : > { %v612_v12 = vstv %s1817_s8  ;;  %s1850_s5 = sld [smem:[#allocation3 + $0x283]]  ;;  %v616_v18 = vstv %s1821_s25  ;;  %v420_v34 = vsub.f32 1.0, %v419_v16  ;;  %vm476_vm2 = vweird.f32 %v1823_v52 }
  0x74   : > { %v569_v4 = vadd.f32 %v568_v53, %v565_v60  ;;  %s1852_s22 = sld [smem:[#allocation3 + $0x284]]  ;;  %v606_v17 = vadd.f32 %v605_v5, %v602_v10  ;;  %v613_v24 = vmul.f32 %v1726_v13, %v612_v12  ;;  %v620_v25 = vstv %s1828_s11 }
  0x75   : > { %s1859_s23 = sld [smem:[#allocation3 + $0x285]]  ;;  %v646_v28 = vstv %s1832_s13  ;;  %v617_v30 = vmul.f32 %v1731_v19, %v616_v18  ;;  %v621_v35 = vmul.f32 %v1735_v23, %v620_v25  ;;  %v421_v45 = vmul.f32 %v1842_v3, %v420_v34 }
  0x76   : > { %v572_v14 = vadd.f32 %v571_v62, %v569_v4  ;;  %v610_v27 = vadd.f32 %v609_v11, %v606_v17  ;;  %v649_v29 = vstv %s1835_s16  ;;  %s1869_s24 = sld [smem:[#allocation3 + $0x286]]  ;;  %v647_v31 = vmul.f32 %v646_v28, %v1704_v0 }
  0x77   : > { %v1854_v15 = vpop.eup %1285  ;;  %v650_v32 = vmul.f32 %v1707_v1, %v649_v29  ;;  %s1877_s20 = sld [smem:[#allocation3 + $0x287]]  ;;  %v427_v0 = vand.u32 2147483647, %v1797_v33  ;;  %v429_v1 = vand.u32 2147483648, %v1797_v33  ;;  %v624_v46 = vstv %s1840_s14 }
  0x78   : > { %v1288_v20 = vpop.eup %1287  ;;  %v472_v21 = vmul.f32 %v1854_v15, %v1823_v52  ;;  %v1122_v22 = vmul.f32 -1.442695, %v572_v14  ;;  %v614_v37 = vadd.f32 %v613_v24, %v610_v27  ;;  %v653_v39 = vstv %s1846_s21  ;;  %s1899_s18 = sld [smem:[#allocation8 + $0x5]] }
  0x79   : > { %v1865_v26 = vadd.f32 1.0, %v1288_v20  ;;  %v651_v38 = vadd.f32 %v650_v32, %v647_v31  ;;  %v654_v40 = vmul.f32 %v1712_v6, %v653_v39  ;;  %v657_v41 = vstv %s1850_s5  ;;  %s1909_s30 = sld [smem:[#allocation9]] }
  0x7a   : > { %1289 = vpow2.f32 %v1122_v22  ;;  %v473_v36 = vsub.f32 1.0, %v472_v21  ;;  %v618_v42 = vadd.f32 %v617_v30, %v614_v37  ;;  %v658_v43 = vmul.f32 %v1715_v7, %v657_v41  ;;  %s1921_s8 = sld [smem:[#allocation9 + $0x1]] }
  0x7b   : > { %1291 = vrcp.f32 %v1865_v26  ;;  %v661_v44 = vstv %s1852_s22  ;;  %v655_v47 = vadd.f32 %v654_v40, %v651_v38  ;;  %v665_v48 = vstv %s1859_s23  ;;  %s1932_s25 = sld [smem:[#allocation9 + $0x2]] }
  0x7c   : > { %v474_v50 = vmul.f32 %v1854_v15, %v473_v36  ;;  %v622_v6 = vadd.f32 %v621_v35, %v618_v42  ;;  %v662_v51 = vmul.f32 %v1720_v9, %v661_v44  ;;  %v480_v54 = vand.u32 2147483647, %v1823_v52  ;;  %s1937_s11 = sld [smem:[#allocation9 + $0x3]] }
  0x7d   : > { %v659_v55 = vadd.f32 %v658_v43, %v655_v47  ;;  %v669_v56 = vstv %s1869_s24  ;;  %vm477_vm3 = vweird.f32 %v1854_v15  ;;  %v666_v59 = vmul.f32 %v1726_v13, %v665_v48  ;;  %s1942_s13 = sld [smem:[#allocation9 + $0x80]] }
  0x7e   : > { %v625_v58 = vadd.f32 %v624_v46, %v622_v6  ;;  %v422_v9 = vadd.f32 %v1842_v3, %v421_v45  ;;  %v482_v60 = vand.u32 2147483648, %v1823_v52  ;;  %v673_v61 = vstv %s1877_s20  ;;  %vm1927_vm5 = vmor %vm476_vm2, %vm477_vm3  ;;  %s1948_s16 = sld [smem:[#allocation9 + $0x81]] }
  0x7f   : > { %v475_v63 = vadd.f32 %v1854_v15, %v474_v50  ;;  %v663_v2 = vadd.f32 %v662_v51, %v659_v55  ;;  %v670_v4 = vmul.f32 %v1731_v19, %v669_v56  ;;  %v430_v8 = vor.u32 1.1754944e-38, %v429_v1  ;;  %s1955_s14 = sld [smem:[#allocation9 + $0x82]] }
  0x80   : > { %v1290_v49 = vpop.eup %1289  ;;  %v1132_v13 = vmul.f32 -1.442695, %v625_v58  ;;  %v674_v11 = vmul.f32 %v1735_v23, %v673_v61  ;;  %v426_v19 = vsel %vm1915_vm4, %v1842_v3, %v422_v9  ;;  %vm428_vm6 = vcmp.eq.f32.partialorder %v427_v0, 8.507059e+37  ;;  %s1962_s21 = sld [smem:[#allocation9 + $0x100]] }
  0x81   : > { %v1893_v53 = vpop.eup %1291  ;;  %v1896_v7 = vadd.f32 1.0, %v1290_v49  ;;  %v667_v10 = vadd.f32 %v666_v59, %v663_v2  ;;  %v483_v12 = vor.u32 1.1754944e-38, %v482_v60  ;;  %v479_v52 = vsel %vm1927_vm5, %v1854_v15, %v475_v63  ;;  %s1966_s5 = sld [smem:[#allocation9 + $0x101]] }
  0x82   : > { %v525_v57 = vmul.f32 %v1893_v53, %v1865_v26  ;;  %vm481_vm7 = vcmp.eq.f32.partialorder %v480_v54, 8.507059e+37  ;;  %v677_v17 = vstv %s1899_s18  ;;  %v1950_v3 = vsel %vm428_vm6, %v430_v8, %v426_v19  ;;  %s1972_s22 = sld [smem:[#allocation9 + $0x102]] }
  0x83   : > { %1293 = vrcp.f32 %v1896_v7  ;;  %v671_v14 = vadd.f32 %v670_v4, %v667_v10  ;;  %vm529_vm8 = vweird.f32 %v1865_v26  ;;  %v1957_v20 = vsel %vm481_vm7, %v483_v12, %v479_v52  ;;  %s1982_s23 = sld [smem:[#allocation9 + $0x180]] }
  0x84   : > { %v526_v33 = vsub.f32 1.0, %v525_v57  ;;  %1295 = vpow2.f32 %v1132_v13  ;;  %vm530_vm9 = vweird.f32 %v1893_v53  ;;  %v533_v21 = vand.u32 2147483647, %v1865_v26  ;;  %s1987_s24 = sld [smem:[#allocation9 + $0x181]] }
  0x85   : > { %v675_v18 = vadd.f32 %v674_v11, %v671_v14  ;;  %v535_v22 = vand.u32 2147483648, %v1865_v26  ;;  %v699_v28 = vstv %s1909_s30  ;;  %v702_v29 = vstv %s1921_s8  ;;  %vm1976_vm10 = vmor %vm529_vm8, %vm530_vm9  ;;  %s1991_s20 = sld [smem:[#allocation9 + $0x182]] }
  0x86   : > { %v527_v23 = vmul.f32 %v1893_v53, %v526_v33  ;;  %v586_v31 = vand.u32 2147483647, %v1896_v7  ;;  %v588_v36 = vand.u32 2147483648, %v1896_v7  ;;  %v700_v38 = vmul.f32 %v699_v28, %v1950_v3  ;;  %s2003_s18 = sld [smem:[#allocation9 + $0x83]] }
  0x87   : > { %v678_v27 = vadd.f32 %v677_v17, %v675_v18  ;;  %v703_v39 = vmul.f32 %v702_v29, %v1957_v20  ;;  %v536_v26 = vor.u32 1.1754944e-38, %v535_v22  ;;  %vm582_vm11 = vweird.f32 %v1896_v7  ;;  %s2012_s30 = sld [smem:[#allocation9 + $0x103]] }
  0x88   : > { %v528_v30 = vadd.f32 %v1893_v53, %v527_v23  ;;  %vm534_vm13 = vcmp.eq.f32.partialorder %v533_v21, 8.507059e+37  ;;  %v744_v1 = vstv %s1942_s13  ;;  %v747_v40 = vstv %s1948_s16  ;;  %s2017_s8 = sld [smem:[#allocation9 + $0x183]] }
  0x89   : > { %v1944_v16 = vpop.eup %1293  ;;  %v1142_v37 = vmul.f32 -1.442695, %v678_v27  ;;  %vm1999_vm14 = vcmp.eq.f32.partialorder %v586_v31, 8.507059e+37  ;;  %v589_v43 = vor.u32 1.1754944e-38, %v588_v36  ;;  %v704_v45 = vadd.f32 %v703_v39, %v700_v38  ;;  %s2039_s13 = sld [smem:[#allocation9 + $0x104]] }
  0x8a   : > { %v578_v15 = vmul.f32 %v1944_v16, %v1896_v7  ;;  %v1296_v24 = vpop.eup %1295  ;;  %vm583_vm12 = vweird.f32 %v1944_v16  ;;  %v532_v0 = vsel %vm1976_vm10, %v1893_v53, %v528_v30  ;;  %v706_v46 = vstv %s1932_s25  ;;  %s2028_s25 = sld [smem:[#allocation9 + $0x4]] }
  0x8b   : > { %v1970_v32 = vadd.f32 1.0, %v1296_v24  ;;  %vm2005_vm15 = vmor %vm582_vm11, %vm583_vm12  ;;  %v710_v47 = vstv %s1937_s11  ;;  %v789_v48 = vstv %s1962_s21  ;;  %v537_v49 = vsel %vm534_vm13, %v536_v26, %v532_v0  ;;  %s2033_s11 = sld [smem:[#allocation9 + $0x84]] }
  0x8c   : > { %v579_v25 = vsub.f32 1.0, %v578_v15  ;;  %v745_v50 = vmul.f32 %v744_v1, %v1950_v3  ;;  %v748_v6 = vmul.f32 %v747_v40, %v1957_v20  ;;  %v792_v51 = vstv %s1966_s5  ;;  %s2044_s16 = sld [smem:[#allocation9 + $0x184]] }
  0x8d   : > { %1297 = vrcp.f32 %v1970_v32  ;;  %vm635_vm0 = vweird.f32 %v1970_v32  ;;  %v751_v54 = vstv %s1955_s14  ;;  %v834_v7 = vstv %s1982_s23  ;;  %s2055_s14 = sld [smem:[#allocation9 + $0x5]] }
  0x8e   : > { %v580_v35 = vmul.f32 %v1944_v16, %v579_v25  ;;  %1299 = vpow2.f32 %v1142_v37  ;;  %v837_v55 = vstv %s1987_s24  ;;  %v641_v59 = vand.u32 2147483648, %v1970_v32  ;;  %s2059_s21 = sld [smem:[#allocation9 + $0x85]] }
  0x8f   : > { %v790_v9 = vmul.f32 %v789_v48, %v1950_v3  ;;  %v793_v61 = vmul.f32 %v792_v51, %v1957_v20  ;;  %v835_v62 = vmul.f32 %v834_v7, %v1950_v3  ;;  %v838_v63 = vmul.f32 %v837_v55, %v1957_v20  ;;  %s2063_s5 = sld [smem:[#allocation9 + $0x105]] }
  0x90   : > { %v581_v41 = vadd.f32 %v1944_v16, %v580_v35  ;;  %v796_v2 = vstv %s1972_s22  ;;  %v841_v4 = vstv %s1991_s20  ;;  %v639_v5 = vand.u32 2147483647, %v1970_v32  ;;  %s2065_s22 = sld [smem:[#allocation9 + $0x185]] }
  0x91   : > { %v707_v33 = vmul.f32 %v706_v46, %v537_v49  ;;  %v749_v8 = vadd.f32 %v748_v6, %v745_v50  ;;  %v752_v19 = vmul.f32 %v751_v54, %v537_v49  ;;  %v755_v12 = vstv %s2003_s18  ;;  %s2069_s23 = sld [smem:[#allocation11]] }
  0x92   : > { %v585_v57 = vsel %vm2005_vm15, %v1944_v16, %v581_v41  ;;  %v794_v14 = vadd.f32 %v793_v61, %v790_v9  ;;  %v797_v16 = vmul.f32 %v796_v2, %v537_v49  ;;  %v839_v23 = vadd.f32 %v838_v63, %v835_v62  ;;  %s2073_s24 = sld [smem:[#allocation11 + $0x1]] }
  0x93   : > { %v1298_v53 = vpop.eup %1297  ;;  %v590_v10 = vsel %vm1999_vm14, %v589_v43, %v585_v57  ;;  %v842_v17 = vmul.f32 %v841_v4, %v537_v49  ;;  %v642_v15 = vor.u32 1.1754944e-38, %v641_v59  ;;  %v800_v18 = vstv %s2012_s30  ;;  %s2079_s20 = sld [smem:[#allocation11 + $0x2]] }
  0x94   : > { %v1300_v56 = vpop.eup %1299  ;;  %v631_v58 = vmul.f32 %v1298_v53, %v1970_v32  ;;  %vm636_vm1 = vweird.f32 %v1298_v53  ;;  %v845_v20 = vstv %s2017_s8  ;;  %vm640_vm3 = vcmp.eq.f32.partialorder %v639_v5, 8.507059e+37  ;;  %s2081_s18 = sld [smem:[#allocation11 + $0x3]] }
  0x95   : > { %v2031_v60 = vadd.f32 1.0, %v1300_v56  ;;  %vm2051_vm2 = vmor %vm635_vm0, %vm636_vm1  ;;  %v708_v21 = vadd.f32 %v707_v33, %v704_v45  ;;  %v711_v22 = vmul.f32 %v710_v47, %v590_v10  ;;  %v753_v25 = vadd.f32 %v752_v19, %v749_v8  ;;  %s2091_s30 = sld [smem:[#allocation13]] }
  0x96   : > { %v632_v13 = vsub.f32 1.0, %v631_v58  ;;  %v756_v27 = vmul.f32 %v755_v12, %v590_v10  ;;  %v798_v29 = vadd.f32 %v797_v16, %v794_v14  ;;  %v801_v30 = vmul.f32 %v800_v18, %v590_v10  ;;  %s2093_s8 = sld [smem:[#allocation13 + $0x1]] }
  0x97   : > { %1301 = vrcp.f32 %v2031_v60  ;;  %v843_v31 = vadd.f32 %v842_v17, %v839_v23  ;;  %v846_v32 = vmul.f32 %v845_v20, %v590_v10  ;;  %v714_v36 = vstv %s2028_s25  ;;  %s2104_s25 = sld [smem:[#allocation13 + $0x2]] }
  0x98   : > { %v633_v11 = vmul.f32 %v1298_v53, %v632_v13  ;;  %v759_v37 = vstv %s2033_s11  ;;  %v694_v38 = vand.u32 2147483648, %v2031_v60  ;;  %v712_v39 = vadd.f32 %v711_v22, %v708_v21  ;;  %s2106_s11 = sld [smem:[#allocation13 + $0x3]] }
  0x99   : > { %v804_v26 = vstv %s2039_s13  ;;  %v849_v0 = vstv %s2044_s16  ;;  %vm688_vm4 = vweird.f32 %v2031_v60  ;;  %v692_v40 = vand.u32 2147483647, %v2031_v60  ;;  %s893_s13 = sld [smem:[#allocation2]]  ;;  %s1077_s16 = sshll.u32 %s1693_s10, 2 }
  0x9a   : > { %v634_v3 = vadd.f32 %v1298_v53, %v633_v11  ;;  %v757_v42 = vadd.f32 %v756_v27, %v753_v25  ;;  %v802_v43 = vadd.f32 %v801_v30, %v798_v29  ;;  %v847_v44 = vadd.f32 %v846_v32, %v843_v31 }
  0x9b   : > { %v695_v49 = vor.u32 1.1754944e-38, %v694_v38  ;;  %vm693_vm7 = vcmp.eq.f32.partialorder %v692_v40, 8.507059e+37  ;;  %v718_v6 = vstv %s2055_s14  ;;  %v808_v54 = vstv %s2063_s5  ;;  %s1178_s14 = sshll.u32 %s1584_s9, 2  ;;  %s921_s9 = scalar_lea.sflag [#allocation5], %s1693_s10 }
  0x9c   : > { %v638_v24 = vsel %vm2051_vm2, %v1298_v53, %v634_v3  ;;  %v763_v53 = vstv %s2059_s21  ;;  %v853_v7 = vstv %s2065_s22  ;;  %v722_v63 = vstv %s2069_s23  ;;  %s931_s22 = scalar_lea.hbm %s2186_s7, %s1178_s14  ;;  %s362_s23 = scalar_lea.vmem [#allocation15], %s1077_s16 }
  0x9d   : > { %v1302_v28 = vpop.eup %1301  ;;  %v643_v34 = vsel %vm640_vm3, %v642_v15, %v638_v24  ;;  %v767_v13 = vstv %s2073_s24  ;;  %v812_v2 = vstv %s2079_s20  ;;  %v857_v4 = vstv %s2081_s18  ;;  %s933_s24 = sshll.u32 %s362_s23, 4  ;;  %s935_s20 = sshll.u32 %s931_s22, 4  ;;  %s934_s24 = int_to_ptr.vmem [resolvable:$true] %s933_s24  ;;  %s936_s20 = int_to_ptr.hbm [resolvable:$true] %s935_s20 }
  0x9e   : > { %v684_v35 = vmul.f32 %v1302_v28, %v2031_v60  ;;  %vm689_vm5 = vweird.f32 %v1302_v28  ;;  %v715_v41 = vmul.f32 %v714_v36, %v643_v34  ;;  %v760_v46 = vmul.f32 %v759_v37, %v643_v34  ;;  %s1442_s18 = sshra.s32 %s936_s20, 4  ;;  %s1443_s18 = int_to_ptr.hbm [resolvable:$true] %s1442_s18 }
  0x9f   : > { %v805_v47 = vmul.f32 %v804_v26, %v643_v34  ;;  %v850_v48 = vmul.f32 %v849_v0, %v643_v34  ;;  %vm690_vm6 = vmor %vm688_vm4, %vm689_vm5  ;;  %v879_v36 = vstv %s2091_s30  ;;  %s1444_s30 = scalar_lea.hbm %s1443_s18, 4  ;;  %p1449_p12 = scmp.lt.s32.totalorder %s1443_s18, %s2186_s7 }
  0xa0   : > { %v685_v1 = vsub.f32 1.0, %v684_v35  ;;  %v716_v51 = vadd.f32 %v715_v41, %v712_v39  ;;  %v761_v56 = vadd.f32 %v760_v46, %v757_v42  ;;  %p1445_p1 = scmp.ne.s32.totalorder %s1443_s18, %s1444_s30 }
  0xa1   : > { %v806_v57 = vadd.f32 %v805_v47, %v802_v43  ;;  %v851_v58 = vadd.f32 %v850_v48, %v847_v44 }
  0xa2   : > { %v686_v45 = vmul.f32 %v1302_v28, %v685_v1  ;;  %p1446_p3 = pnand %p1445_p1, %p1646_p13 }
  0xa4   : > { %v687_v50 = vadd.f32 %v1302_v28, %v686_v45  ;;  %p1447_p4 = pneg %p1446_p3 }
  0xa6   : > { %v691_v55 = vsel %vm690_vm6, %v1302_v28, %v687_v50 }
  0xa7   : > { %v696_v59 = vsel %vm693_vm7, %v695_v49, %v691_v55 }
  0xa8   : > { %v719_v9 = vmul.f32 %v718_v6, %v696_v59  ;;  %v764_v60 = vmul.f32 %v763_v53, %v696_v59  ;;  %v809_v61 = vmul.f32 %v808_v54, %v696_v59  ;;  %v854_v62 = vmul.f32 %v853_v7, %v696_v59 }
  0xaa   : > { %v720_v5 = vadd.f32 %v719_v9, %v716_v51  ;;  %v765_v33 = vadd.f32 %v764_v60, %v761_v56  ;;  %v810_v8 = vadd.f32 %v809_v61, %v806_v57  ;;  %v855_v10 = vadd.f32 %v854_v62, %v851_v58 }
  0xab   : > { %v882_v58 = vstv %s2093_s8 }
  0xac   : > { %v723_v11 = vadd.f32 %v722_v63, %v720_v5  ;;  %v768_v19 = vadd.f32 %v767_v13, %v765_v33  ;;  %v813_v12 = vadd.f32 %v812_v2, %v810_v8  ;;  %v858_v52 = vadd.f32 %v857_v4, %v855_v10 }
  0xad   : > { %v886_v8 = vstv %s2104_s25 }
  0xae   : > { %v1148_v14 = vmul.f32 -1.442695, %v723_v11  ;;  %v1156_v16 = vmul.f32 -1.442695, %v768_v19  ;;  %v1164_v23 = vmul.f32 -1.442695, %v813_v12  ;;  %v890_v11 = vstv %s2106_s11 }
  0xaf   : > { %v1172_v17 = vmul.f32 -1.442695, %v858_v52  ;;  %s1448_s11 = scalar_lea.hbm %s2186_s7, 8 }
  0xb0   : > { %1303 = vpow2.f32 %v1148_v14  ;;  %p1450_p8 = scmp.lt.s32.totalorder %s1448_s11, %s1444_s30 }
  0xb1   : > { %1305 = vpow2.f32 %v1156_v16 }
  0xb2   : > { %1307 = vpow2.f32 %v1164_v23  ;;  %p1451_p7 = por %p1450_p8, %p1449_p12 }
  0xb3   : > { %1309 = vpow2.f32 %v1172_v17 }
  0xb4   : > { %p1452_p9 = pnand %p1451_p7, %p1447_p4 }
  0xb6   : > { %v1304_v3 = vpop.eup %1303 }
  0xb7   : > { %v1306_v15 = vpop.eup %1305  ;;  %v727_v18 = vadd.f32 1.0, %v1304_v3  ;;  %v894_v3 = vstv %s893_s13 }
  0xb8   : > { %v1308_v20 = vpop.eup %1307  ;;  %v772_v21 = vadd.f32 1.0, %v1306_v15 }
  0xb9   : > { %v1310_v22 = vpop.eup %1309  ;;  %1311 = vrcp.f32 %v727_v18  ;;  %v817_v24 = vadd.f32 1.0, %v1308_v20  ;;  %v737_v27 = vand.u32 2147483647, %v727_v18  ;;  %v739_v28 = vand.u32 2147483648, %v727_v18 }
  0xba   : > { %1313 = vrcp.f32 %v772_v21  ;;  %v862_v25 = vadd.f32 1.0, %v1310_v22  ;;  %v782_v30 = vand.u32 2147483647, %v772_v21  ;;  %v784_v31 = vand.u32 2147483648, %v772_v21 }
  0xbb   : > { %1315 = vrcp.f32 %v817_v24  ;;  %vm733_vm8 = vweird.f32 %v727_v18  ;;  %vm778_vm9 = vweird.f32 %v772_v21  ;;  %vm2096_vm11 = vcmp.eq.f32.partialorder %v737_v27, 8.507059e+37 }
  0xbc   : > { %1317 = vrcp.f32 %v862_v25  ;;  %v740_v39 = vor.u32 1.1754944e-38, %v739_v28  ;;  %vm2100_vm13 = vcmp.eq.f32.partialorder %v782_v30, 8.507059e+37  ;;  %v785_v40 = vor.u32 1.1754944e-38, %v784_v31 }
  0xbd   : > { %vm823_vm14 = vweird.f32 %v817_v24  ;;  %v827_v44 = vand.u32 2147483647, %v817_v24  ;;  %v829_v47 = vand.u32 2147483648, %v817_v24  ;;  %vm868_vm0 = vweird.f32 %v862_v25 }
  0xbe   : > { %v874_v51 = vand.u32 2147483648, %v862_v25  ;;  %v872_v7 = vand.u32 2147483647, %v862_v25  ;;  %v915_v30 = vlaneseq }
  0xbf   : > { %v1312_v29 = vpop.eup %1311  ;;  %vm2122_vm4 = vcmp.eq.f32.partialorder %v827_v44, 8.507059e+37  ;;  %v830_v61 = vor.u32 1.1754944e-38, %v829_v47 }
  0xc0   : > { %v1314_v32 = vpop.eup %1313  ;;  %v729_v34 = vmul.f32 %v1312_v29, %v727_v18  ;;  %vm734_vm10 = vweird.f32 %v1312_v29  ;;  %v875_v2 = vor.u32 1.1754944e-38, %v874_v51  ;;  %vm873_vm7 = vcmp.eq.f32.partialorder %v872_v7, 8.507059e+37 }
  0xc1   : > { %v774_v35 = vmul.f32 %v1314_v32, %v772_v21  ;;  %v1316_v26 = vpop.eup %1315  ;;  %vm779_vm12 = vweird.f32 %v1314_v32  ;;  %vm2110_vm15 = vmor %vm733_vm8, %vm734_vm10 }
  0xc2   : > { %v730_v37 = vsub.f32 1.0, %v729_v34  ;;  %v1318_v41 = vpop.eup %1317  ;;  %v819_v43 = vmul.f32 %v1316_v26, %v817_v24  ;;  %vm2116_vm1 = vmor %vm778_vm9, %vm779_vm12  ;;  %vm824_vm2 = vweird.f32 %v1316_v26  ;;  %vm917_vm12 = vcmp.lt.s32.totalorder %v915_v30, 512 }
  0xc3   : > { %v775_v0 = vsub.f32 1.0, %v774_v35  ;;  %v864_v48 = vmul.f32 %v1318_v41, %v862_v25  ;;  %vm869_vm3 = vweird.f32 %v1318_v41  ;;  %vm2132_vm5 = vmor %vm823_vm14, %vm824_vm2 }
  0xc4   : > { %v731_v42 = vmul.f32 %v1312_v29, %v730_v37  ;;  %v820_v6 = vsub.f32 1.0, %v819_v43  ;;  %vm870_vm6 = vmor %vm868_vm0, %vm869_vm3 }
  0xc5   : > { %v776_v46 = vmul.f32 %v1314_v32, %v775_v0  ;;  %v865_v54 = vsub.f32 1.0, %v864_v48 }
  0xc6   : > { %v732_v49 = vadd.f32 %v1312_v29, %v731_v42  ;;  %v821_v56 = vmul.f32 %v1316_v26, %v820_v6 }
  0xc7   : > { %v777_v53 = vadd.f32 %v1314_v32, %v776_v46  ;;  %v866_v62 = vmul.f32 %v1318_v41, %v865_v54 }
  0xc8   : > { %v736_v55 = vsel %vm2110_vm15, %v1312_v29, %v732_v49  ;;  %v822_v13 = vadd.f32 %v1316_v26, %v821_v56 }
  0xc9   : > { %v741_v59 = vsel %vm2096_vm11, %v740_v39, %v736_v55  ;;  %v781_v9 = vsel %vm2116_vm1, %v1314_v32, %v777_v53  ;;  %v867_v5 = vadd.f32 %v1318_v41, %v866_v62 }
  0xca   : > { %v786_v63 = vsel %vm2100_vm13, %v785_v40, %v781_v9  ;;  %v880_v4 = vmul.f32 %v879_v36, %v741_v59  ;;  %v826_v10 = vsel %vm2132_vm5, %v1316_v26, %v822_v13 }
  0xcb   : > { %v883_v33 = vmul.f32 %v882_v58, %v786_v63  ;;  %v831_v19 = vsel %vm2122_vm4, %v830_v61, %v826_v10  ;;  %v871_v12 = vsel %vm870_vm6, %v1318_v41, %v867_v5 }
  0xcc   : > { %v876_v14 = vsel %vm873_vm7, %v875_v2, %v871_v12  ;;  %v887_v16 = vmul.f32 %v886_v8, %v831_v19 }
  0xcd   : > { %v884_v52 = vadd.f32 %v883_v33, %v880_v4  ;;  %v891_v23 = vmul.f32 %v890_v11, %v876_v14 }
  0xcf   : > { %v888_v17 = vadd.f32 %v887_v16, %v884_v52 }
  0xd1   : > { %v892_v15 = vadd.f32 %v891_v23, %v888_v17 }
  0xd3   : > { %v895_v18 = vadd.f32 %v894_v3, %v892_v15 }
  0xd5   : > { %v1176_v20 = vmul.f32 -1.442695, %v895_v18 }
  0xd7   : > { %1319 = vpow2.f32 %v1176_v20 }
  0xdd   : > { %v1320_v21 = vpop.eup %1319 }
  0xde   : > { %v899_v22 = vadd.f32 1.0, %v1320_v21 }
  0xe0   : > { %1321 = vrcp.f32 %v899_v22  ;;  %v911_v27 = vand.u32 2147483648, %v899_v22  ;;  %vm905_vm8 = vweird.f32 %v899_v22  ;;  %v909_v29 = vand.u32 2147483647, %v899_v22 }
  0xe2   : > { %v912_v32 = vor.u32 1.1754944e-38, %v911_v27  ;;  %vm910_vm11 = vcmp.eq.f32.partialorder %v909_v29, 8.507059e+37 }
  0xe6   : > { %v1322_v24 = vpop.eup %1321 }
  0xe7   : > { %v901_v25 = vmul.f32 %v1322_v24, %v899_v22  ;;  %vm906_vm9 = vweird.f32 %v1322_v24 }
  0xe8   : > { %vm907_vm10 = vmor %vm905_vm8, %vm906_vm9 }
  0xe9   : > { %v902_v28 = vsub.f32 1.0, %v901_v25 }
  0xeb   : > { %v903_v31 = vmul.f32 %v1322_v24, %v902_v28 }
  0xed   : > { %v904_v34 = vadd.f32 %v1322_v24, %v903_v31 }
  0xef   : > { %v908_v35 = vsel %vm907_vm10, %v1322_v24, %v904_v34 }
  0xf0   : > { %v913_v36 = vsel %vm910_vm11, %v912_v32, %v908_v35 }
  0xf1   : > { %919 = vst.msk [vmem:[%s362_s23] sm:$0xf] %vm917_vm12, %v913_v36 }
  0xf2   : > { %1455 = shalt.err (!%p1452_p9)
}
  0xf3   : > { %1204 = dma.vmem_to_hbm [thread:$0]  (%p1646_p13), %s934_s24, 64, %s936_s20, %s921_s9  }
  0xf4 PF: > { %s947_s10 = sand.u32 1, %s1498_s26   ;;  %p2217_p10 = scmp.ge.s32.totalorder %s1510_s29, 2 }
  0xf5   : > { %s948_s14 = scalar_lea.sflag [#allocation5], %s947_s10 }
  0xf6   : > { %p1227_p11 = pnand %p2217_p10, %p1651_p5 }
  0xf8   : > { %p1228_p0 = pneg %p1227_p11 }
  0xfa   : > { %1493 = dma.done.wait (%p1228_p0), %s948_s14, 64  }
  0xfb   : > { %1495 = vsyncadd (%p1228_p0), %s948_s14, 4294967232  ;;  %p25_p2 = scmp.ge.s32.totalorder %s1626_s12, 4   ;;  %s2218_s26 = smov %s1502_s27 }
  0xfc   : > { %s2219_s27 = smov %s1506_s28  ;;  %s2220_s28 = smov %s1638_s15 }
  0xfd   : > { %s2221_s29 = smov %s1626_s12  ;;  %27 = sbr.rel (!%p25_p2) target bundleno = 11 (0xb), region = 122 }
 0x102   :  { %954 = vsyncpa [#allocation4], 1 }
 0x103   :  { %956 = vsyncpa [#allocation4 + $0x1], 1 }
 0x104   :  { %957 = vsyncpa [#allocation5], 1 }
 0x105   :  { %959 = vsyncpa [#allocation5 + $0x1], 1 }
 0x106   :  { %960 = vsyncpa [#allocation6], 1 }
 0x107   :  { %962 = vsyncpa [#allocation6 + $0x1], 1 }
 0x108   :  { %963 = vsyncpa [#allocation10], 1 }
 0x109   :  { %964 = vsyncpa [#allocation7], 1 }
 0x10a   :  { %966 = vsyncpa [#allocation7 + $0x1], 1 }
 0x10b   :  { %967 = vsyncpa [#allocation12], 1 }

</bundles_post_ra>
